<compile_context>
chip_gen: v7x
topology: tpu7x:2x2x1
jax: 0.10.0
libtpu: 0.0.40
codegen_flags: <defaults>
</compile_context>

<pallas_src>
import functools

import numpy as np
import jax
import jax.numpy as jnp
from jax.experimental import pallas as pl
from jax.experimental.pallas import tpu as pltpu

# small, module-consistent sizes
B = 4              # batch
HOP = 32           # waveform samples per frame (stand-in hop_length)
T = 16             # mel frames
L = T * HOP        # waveform samples per item
N_MELS = 16        # mel bins (scaled down from 64)
D_MODEL = 64       # Whisper d_model (scaled down from 768)
EMB = 32           # TrainingParams.embedding_dim
NUM_CLASSES = 5
K_PROTO = 3


# ----------------------------------------------------------------------------
# Fused kernel: feature stand-in -> conv stem -> mean+proj -> QueryAttention
# ----------------------------------------------------------------------------
def _fused_kernel(xf_ref, melb_ref, shp_ref, shn_ref, w1_ref, b1_ref,
                  sop_ref, sev_ref, sod_ref, w2_ref, b2_ref, meanm_ref,
                  projw_ref, projb_ref, w1q_ref, pflat_ref, w1pbd_ref,
                  b1f_ref, w2bd_ref, b2f_ref, pkce_ref, temp_ref, o_ref):
    dot = lambda a, b: jnp.dot(a, b, preferred_element_type=jnp.float32)

    # --- feature-extraction stand-in: frame projection + log compression -----
    # TODO(synk): real WhisperProcessor log-mel STFT (pretrained filterbank) is
    # not reproduced; deterministic frame projection + log(1+|.|) used instead.
    mel = jnp.log(1.0 + jnp.abs(dot(xf_ref[...], melb_ref[...])))       # (B*T, NM)

    # --- conv1: kernel 3, stride 1, pad 1, + GELU ----------------------------
    # In-VMEM im2col: +/-1 time shifts via constant 0/1 matmuls; all 3 taps
    # folded into the contraction dim of ONE MXU push (K = 3*N_MELS).
    x1 = jnp.concatenate(
        [dot(shp_ref[...], mel), mel, dot(shn_ref[...], mel)], axis=1)   # (B*T, 3NM)
    # TODO(synk): Whisper / nn.GELU use exact erf GELU; tanh approximation here.
    h1 = jax.nn.gelu(dot(x1, w1_ref[...]) + b1_ref[...])                 # (B*T, D)

    # --- conv2: kernel 3, stride 2, pad 1, + GELU ----------------------------
    x2 = jnp.concatenate(
        [dot(sop_ref[...], h1),      # rows 2*t2-1 (zero-padded at t2 == 0)
         dot(sev_ref[...], h1),      # rows 2*t2
         dot(sod_ref[...], h1)],     # rows 2*t2+1
        axis=1)                                                          # (B*T2, 3D)
    h2 = jax.nn.gelu(dot(x2, w2_ref[...]) + b2_ref[...])                 # (B*T2, D)
    # TODO(synk): pretrained Whisper positional embedding, transformer encoder
    # layers and final LayerNorm are frozen checkpoint weights -> omitted.

    # --- last_hidden_state.mean(dim=1) + self.proj (folded epilogue) ---------
    q = dot(dot(meanm_ref[...], h2), projw_ref[...]) + projb_ref[...]    # (B, E)

    # --- per-class QueryAttention, classes vectorized on the lane axis -------
    #   qw     : (B,E)@(E,C*E)        query half of Linear(2E->E)
    #   pw     : (K,C*E)@(C*E,C*E)    proto half (block-diagonal weights)
    #   scores : (B,C*E)@(C*E,C)      block-diag w2 -> MXU score reduction
    qw = dot(q, w1q_ref[...])                                            # (B, C*E)
    pw = dot(pflat_ref[...], w1pbd_ref[...])                             # (K, C*E)
    b1f = b1f_ref[...]
    w2bd = w2bd_ref[...]
    b2f = b2f_ref[...]
    kp = pw.shape[0]
    scores = []
    for kk in range(kp):                                   # K=3, static unroll
        hid_k = jnp.tanh(qw + pw[kk:kk + 1, :] + b1f)                    # (B, C*E)
        scores.append(dot(hid_k, w2bd) + b2f)                            # (B, C)
    # softmax over the K prototypes (elementwise across the unrolled arrays)
    smax = scores[0]
    for s in scores[1:]:
        smax = jnp.maximum(smax, s)
    exps = [jnp.exp(s - smax) for s in scores]
    denom = exps[0]
    for ev in exps[1:]:
        denom = denom + ev
    inv = pl.reciprocal(denom, approx=True)
    # attention-pooled prototype per (batch, class), then euclidean distance
    fp = (exps[0] * inv)[:, :, None] * pkce_ref[0][None, :, :]           # (B, C, E)
    for kk in range(1, kp):
        fp = fp + (exps[kk] * inv)[:, :, None] * pkce_ref[kk][None, :, :]
    diff = q[:, None, :] - fp
    dist = jnp.sqrt(jnp.sum(diff * diff, axis=-1))                       # (B, C)
    o_ref[...] = -dist * temp_ref[...]                                   # (B, C)


# ----------------------------------------------------------------------------
# Constant 0/1 matrices encoding conv padding/shift/stride-2 and the time-mean
# ----------------------------------------------------------------------------
def _structure_matrices(bn, tn):
    bt = bn * tn
    t2n = (tn - 1) // 2 + 1
    bt2 = bn * t2n
    g = np.arange(bt)
    t = g % tn
    shp = np.zeros((bt, bt), np.float32)                    # out t <- in t-1
    shp[g[t >= 1], (g - 1)[t >= 1]] = 1.0
    shn = np.zeros((bt, bt), np.float32)                    # out t <- in t+1
    shn[g[t <= tn - 2], (g + 1)[t <= tn - 2]] = 1.0
    g2 = np.arange(bt2)
    b2 = g2 // t2n
    t2 = g2 % t2n
    base = b2 * tn + 2 * t2
    sev = np.zeros((bt2, bt), np.float32)                   # out t2 <- in 2*t2
    sev[g2, base] = 1.0
    sod = np.zeros((bt2, bt), np.float32)                   # out t2 <- in 2*t2+1
    ok = (2 * t2 + 1) <= (tn - 1)
    sod[g2[ok], (base + 1)[ok]] = 1.0
    sop = np.zeros((bt2, bt), np.float32)                   # out t2 <- in 2*t2-1
    ok = t2 >= 1
    sop[g2[ok], (base - 1)[ok]] = 1.0
    meanm = np.zeros((bn, bt2), np.float32)                 # per-item mean over T2
    meanm[b2, g2] = 1.0 / t2n
    return (jnp.asarray(shp), jnp.asarray(shn), jnp.asarray(sop),
            jnp.asarray(sev), jnp.asarray(sod), jnp.asarray(meanm))


# ----------------------------------------------------------------------------
# Parameters (deterministic, synthetic -- no checkpoint load)
# ----------------------------------------------------------------------------
def init_params(key):
    ks = jax.random.split(key, 14)
    s = 0.1
    p = {}
    p["mel_basis"] = jax.random.normal(ks[0], (HOP, N_MELS), jnp.float32) * s
    p["conv1_w"] = jax.random.normal(ks[1], (3 * N_MELS, D_MODEL), jnp.float32) * s
    p["conv1_b"] = jax.random.normal(ks[2], (1, D_MODEL), jnp.float32) * s
    p["conv2_w"] = jax.random.normal(ks[3], (3 * D_MODEL, D_MODEL), jnp.float32) * s
    p["conv2_b"] = jax.random.normal(ks[4], (1, D_MODEL), jnp.float32) * s
    p["proj_w"] = jax.random.normal(ks[5], (D_MODEL, EMB), jnp.float32) * s
    p["proj_b"] = jax.random.normal(ks[6], (1, EMB), jnp.float32) * s
    # classifier buffers/params.
    # TODO(synk): sklearn-KMeans prototype fitting (train path) and
    # prototype_valid masking of empty classes are not implemented; prototypes
    # are deterministically initialized and all marked valid.
    p["prototypes"] = jax.random.normal(ks[7], (NUM_CLASSES, K_PROTO, EMB), jnp.float32)
    p["att_w1q"] = jax.random.normal(ks[8], (NUM_CLASSES, EMB, EMB), jnp.float32) * s
    p["att_w1p"] = jax.random.normal(ks[9], (NUM_CLASSES, EMB, EMB), jnp.float32) * s
    p["att_b1"] = jax.random.normal(ks[10], (NUM_CLASSES, 1, EMB), jnp.float32) * s
    p["att_w2"] = jax.random.normal(ks[11], (NUM_CLASSES, 1, EMB), jnp.float32) * s
    p["att_b2"] = jax.random.normal(ks[12], (NUM_CLASSES, 1, 1), jnp.float32) * s
    p["temperature"] = jnp.ones((1, 1), jnp.float32)   # nn.Parameter(torch.ones(1))
    return p


# ----------------------------------------------------------------------------
# Forward (mirrors WhisperEncoder.forward with labels=None / eval prototype path)
# ----------------------------------------------------------------------------
def whisper_encoder_forward(x, p):
    bn, ln = x.shape
    tn = ln // HOP
    c, k, e = NUM_CLASSES, K_PROTO, EMB
    ce = c * e

    xf = x.reshape(bn * tn, HOP)
    shp, shn, sop, sev, sod, meanm = _structure_matrices(bn, tn)

    # classifier weight layout prep (pure parameter plumbing, constant-folded
    # under jit): flatten classes onto the lane axis / block-diagonalize.
    eye = jnp.eye(c, dtype=jnp.float32)
    w1q_flat = jnp.transpose(p["att_w1q"], (1, 0, 2)).reshape(e, ce)          # (E, C*E)
    pkce = jnp.transpose(p["prototypes"], (1, 0, 2))                          # (K, C, E)
    pflat = pkce.reshape(k, ce)                                               # (K, C*E)
    w1p_bd = (p["att_w1p"][:, :, None, :] * eye[:, None, :, None]).reshape(ce, ce)
    w2_bd = (p["att_w2"].reshape(c, e)[:, :, None] * eye[:, None, :]).reshape(ce, c)
    b1f = p["att_b1"].reshape(1, ce)
    b2f = p["att_b2"].reshape(1, c)

    return pl.pallas_call(
        _fused_kernel,
        out_shape=jax.ShapeDtypeStruct((bn, c), jnp.float32),
        compiler_params=pltpu.CompilerParams(vmem_limit_bytes=32 * 1024 * 1024),
    )(xf, p["mel_basis"], shp, shn, p["conv1_w"], p["conv1_b"],
      sop, sev, sod, p["conv2_w"], p["conv2_b"], meanm,
      p["proj_w"], p["proj_b"], w1q_flat, pflat, w1p_bd, b1f, w2_bd, b2f,
      pkce, p["temperature"])


if __name__ == "__main__":
    params = init_params(jax.random.PRNGKey(42))
    x = jax.random.normal(jax.random.PRNGKey(0), (B, L), dtype=jnp.float32)

    fwd = jax.jit(functools.partial(whisper_encoder_forward, p=params))
    logits = fwd(x)
    jax.block_until_ready(logits)

    assert logits.shape == (B, NUM_CLASSES), logits.shape
    assert bool(jnp.all(jnp.isfinite(logits)))
    print("KERNEL_OK")
</pallas_src>

<mosaic_0001>
module attributes {stable_mosaic.version = 11 : i64} {
  func.func @_fused_kernel(%arg0: memref<64x32xf32, #tpu.memory_space<vmem>>, %arg1: memref<32x16xf32, #tpu.memory_space<vmem>>, %arg2: memref<64x64xf32, #tpu.memory_space<vmem>>, %arg3: memref<64x64xf32, #tpu.memory_space<vmem>>, %arg4: memref<48x64xf32, #tpu.memory_space<vmem>>, %arg5: memref<1x64xf32, #tpu.memory_space<vmem>>, %arg6: memref<32x64xf32, #tpu.memory_space<vmem>>, %arg7: memref<32x64xf32, #tpu.memory_space<vmem>>, %arg8: memref<32x64xf32, #tpu.memory_space<vmem>>, %arg9: memref<192x64xf32, #tpu.memory_space<vmem>>, %arg10: memref<1x64xf32, #tpu.memory_space<vmem>>, %arg11: memref<4x32xf32, #tpu.memory_space<vmem>>, %arg12: memref<64x32xf32, #tpu.memory_space<vmem>>, %arg13: memref<1x32xf32, #tpu.memory_space<vmem>>, %arg14: memref<32x160xf32, #tpu.memory_space<vmem>>, %arg15: memref<3x160xf32, #tpu.memory_space<vmem>>, %arg16: memref<160x160xf32, #tpu.memory_space<vmem>>, %arg17: memref<1x160xf32, #tpu.memory_space<vmem>>, %arg18: memref<160x5xf32, #tpu.memory_space<vmem>>, %arg19: memref<1x5xf32, #tpu.memory_space<vmem>>, %arg20: memref<3x5x32xf32, #tpu.memory_space<vmem>>, %arg21: memref<1x1xf32, #tpu.memory_space<vmem>>, %arg22: memref<4x5xf32, #tpu.memory_space<vmem>>) attributes {dimension_semantics = [], scalar_prefetch = 0 : i64, scratch_operands = 0 : i64, tpu.core_type = #tpu.core_type<tc>} {
    %c0 = arith.constant 0 : index
    %c0_0 = arith.constant 0 : index
    %0 = vector.load %arg0[%c0, %c0_0] : memref<64x32xf32, #tpu.memory_space<vmem>>, vector<64x32xf32>
    %c0_1 = arith.constant 0 : index
    %c0_2 = arith.constant 0 : index
    %1 = vector.load %arg1[%c0_1, %c0_2] : memref<32x16xf32, #tpu.memory_space<vmem>>, vector<32x16xf32>
    %cst = arith.constant dense<0.000000e+00> : vector<64x16xf32>
    %2 = tpu.matmul %0, %1, %cst {dimension_numbers = #tpu.dot_dimension_numbers<[1], [0], [0], [1], [0, 0, 1, 1], [], []>} : vector<64x32xf32>, vector<32x16xf32>, vector<64x16xf32> -> vector<64x16xf32>
    %3 = math.absf %2 : vector<64x16xf32>
    %cst_3 = arith.constant 1.000000e+00 : f32
    %4 = vector.broadcast %cst_3 : f32 to vector<64x16xf32>
    %5 = arith.addf %4, %3 : vector<64x16xf32>
    %6 = math.log %5 : vector<64x16xf32>
    %c0_4 = arith.constant 0 : index
    %c0_5 = arith.constant 0 : index
    %7 = vector.load %arg2[%c0_4, %c0_5] : memref<64x64xf32, #tpu.memory_space<vmem>>, vector<64x64xf32>
    %cst_6 = arith.constant dense<0.000000e+00> : vector<64x16xf32>
    %8 = tpu.matmul %7, %6, %cst_6 {dimension_numbers = #tpu.dot_dimension_numbers<[1], [0], [0], [1], [0, 0, 1, 1], [], []>} : vector<64x64xf32>, vector<64x16xf32>, vector<64x16xf32> -> vector<64x16xf32>
    %c0_7 = arith.constant 0 : index
    %c0_8 = arith.constant 0 : index
    %9 = vector.load %arg3[%c0_7, %c0_8] : memref<64x64xf32, #tpu.memory_space<vmem>>, vector<64x64xf32>
    %cst_9 = arith.constant dense<0.000000e+00> : vector<64x16xf32>
    %10 = tpu.matmul %9, %6, %cst_9 {dimension_numbers = #tpu.dot_dimension_numbers<[1], [0], [0], [1], [0, 0, 1, 1], [], []>} : vector<64x64xf32>, vector<64x16xf32>, vector<64x16xf32> -> vector<64x16xf32>
    %11 = tpu.concatenate %8, %6, %10 in 1 : vector<64x16xf32>, vector<64x16xf32>, vector<64x16xf32> -> vector<64x48xf32>
    %c0_10 = arith.constant 0 : index
    %c0_11 = arith.constant 0 : index
    %12 = vector.load %arg4[%c0_10, %c0_11] : memref<48x64xf32, #tpu.memory_space<vmem>>, vector<48x64xf32>
    %cst_12 = arith.constant dense<0.000000e+00> : vector<64x64xf32>
    %13 = tpu.matmul %11, %12, %cst_12 {dimension_numbers = #tpu.dot_dimension_numbers<[1], [0], [0], [1], [0, 0, 1, 1], [], []>} : vector<64x48xf32>, vector<48x64xf32>, vector<64x64xf32> -> vector<64x64xf32>
    %c0_13 = arith.constant 0 : index
    %c0_14 = arith.constant 0 : index
    %14 = vector.load %arg5[%c0_13, %c0_14] : memref<1x64xf32, #tpu.memory_space<vmem>>, vector<1x64xf32>
    %15 = vector.broadcast %14 : vector<1x64xf32> to vector<64x64xf32>
    %16 = arith.addf %13, %15 : vector<64x64xf32>
    %17 = arith.mulf %16, %16 : vector<64x64xf32>
    %18 = arith.mulf %16, %17 : vector<64x64xf32>
    %cst_15 = arith.constant 4.471500e-02 : f32
    %19 = vector.broadcast %cst_15 : f32 to vector<64x64xf32>
    %20 = arith.mulf %19, %18 : vector<64x64xf32>
    %21 = arith.addf %16, %20 : vector<64x64xf32>
    %cst_16 = arith.constant 0.797884583 : f32
    %22 = vector.broadcast %cst_16 : f32 to vector<64x64xf32>
    %23 = arith.mulf %22, %21 : vector<64x64xf32>
    %24 = math.tanh %23 : vector<64x64xf32>
    %cst_17 = arith.constant 1.000000e+00 : f32
    %25 = vector.broadcast %cst_17 : f32 to vector<64x64xf32>
    %26 = arith.addf %25, %24 : vector<64x64xf32>
    %cst_18 = arith.constant 5.000000e-01 : f32
    %27 = vector.broadcast %cst_18 : f32 to vector<64x64xf32>
    %28 = arith.mulf %27, %26 : vector<64x64xf32>
    %29 = arith.mulf %16, %28 : vector<64x64xf32>
    %c0_19 = arith.constant 0 : index
    %c0_20 = arith.constant 0 : index
    %30 = vector.load %arg6[%c0_19, %c0_20] : memref<32x64xf32, #tpu.memory_space<vmem>>, vector<32x64xf32>
    %cst_21 = arith.constant dense<0.000000e+00> : vector<32x64xf32>
    %31 = tpu.matmul %30, %29, %cst_21 {dimension_numbers = #tpu.dot_dimension_numbers<[1], [0], [0], [1], [0, 0, 1, 1], [], []>} : vector<32x64xf32>, vector<64x64xf32>, vector<32x64xf32> -> vector<32x64xf32>
    %c0_22 = arith.constant 0 : index
    %c0_23 = arith.constant 0 : index
    %32 = vector.load %arg7[%c0_22, %c0_23] : memref<32x64xf32, #tpu.memory_space<vmem>>, vector<32x64xf32>
    %cst_24 = arith.constant dense<0.000000e+00> : vector<32x64xf32>
    %33 = tpu.matmul %32, %29, %cst_24 {dimension_numbers = #tpu.dot_dimension_numbers<[1], [0], [0], [1], [0, 0, 1, 1], [], []>} : vector<32x64xf32>, vector<64x64xf32>, vector<32x64xf32> -> vector<32x64xf32>
    %c0_25 = arith.constant 0 : index
    %c0_26 = arith.constant 0 : index
    %34 = vector.load %arg8[%c0_25, %c0_26] : memref<32x64xf32, #tpu.memory_space<vmem>>, vector<32x64xf32>
    %cst_27 = arith.constant dense<0.000000e+00> : vector<32x64xf32>
    %35 = tpu.matmul %34, %29, %cst_27 {dimension_numbers = #tpu.dot_dimension_numbers<[1], [0], [0], [1], [0, 0, 1, 1], [], []>} : vector<32x64xf32>, vector<64x64xf32>, vector<32x64xf32> -> vector<32x64xf32>
    %36 = tpu.concatenate %31, %33, %35 in 1 : vector<32x64xf32>, vector<32x64xf32>, vector<32x64xf32> -> vector<32x192xf32>
    %c0_28 = arith.constant 0 : index
    %c0_29 = arith.constant 0 : index
    %37 = vector.load %arg9[%c0_28, %c0_29] : memref<192x64xf32, #tpu.memory_space<vmem>>, vector<192x64xf32>
    %cst_30 = arith.constant dense<0.000000e+00> : vector<32x64xf32>
    %38 = tpu.matmul %36, %37, %cst_30 {dimension_numbers = #tpu.dot_dimension_numbers<[1], [0], [0], [1], [0, 0, 1, 1], [], []>} : vector<32x192xf32>, vector<192x64xf32>, vector<32x64xf32> -> vector<32x64xf32>
    %c0_31 = arith.constant 0 : index
    %c0_32 = arith.constant 0 : index
    %39 = vector.load %arg10[%c0_31, %c0_32] : memref<1x64xf32, #tpu.memory_space<vmem>>, vector<1x64xf32>
    %40 = vector.broadcast %39 : vector<1x64xf32> to vector<32x64xf32>
    %41 = arith.addf %38, %40 : vector<32x64xf32>
    %42 = arith.mulf %41, %41 : vector<32x64xf32>
    %43 = arith.mulf %41, %42 : vector<32x64xf32>
    %cst_33 = arith.constant 4.471500e-02 : f32
    %44 = vector.broadcast %cst_33 : f32 to vector<32x64xf32>
    %45 = arith.mulf %44, %43 : vector<32x64xf32>
    %46 = arith.addf %41, %45 : vector<32x64xf32>
    %cst_34 = arith.constant 0.797884583 : f32
    %47 = vector.broadcast %cst_34 : f32 to vector<32x64xf32>
    %48 = arith.mulf %47, %46 : vector<32x64xf32>
    %49 = math.tanh %48 : vector<32x64xf32>
    %cst_35 = arith.constant 1.000000e+00 : f32
    %50 = vector.broadcast %cst_35 : f32 to vector<32x64xf32>
    %51 = arith.addf %50, %49 : vector<32x64xf32>
    %cst_36 = arith.constant 5.000000e-01 : f32
    %52 = vector.broadcast %cst_36 : f32 to vector<32x64xf32>
    %53 = arith.mulf %52, %51 : vector<32x64xf32>
    %54 = arith.mulf %41, %53 : vector<32x64xf32>
    %c0_37 = arith.constant 0 : index
    %c0_38 = arith.constant 0 : index
    %55 = vector.load %arg11[%c0_37, %c0_38] : memref<4x32xf32, #tpu.memory_space<vmem>>, vector<4x32xf32>
    %cst_39 = arith.constant dense<0.000000e+00> : vector<4x64xf32>
    %56 = tpu.matmul %55, %54, %cst_39 {dimension_numbers = #tpu.dot_dimension_numbers<[1], [0], [0], [1], [0, 0, 1, 1], [], []>} : vector<4x32xf32>, vector<32x64xf32>, vector<4x64xf32> -> vector<4x64xf32>
    %c0_40 = arith.constant 0 : index
    %c0_41 = arith.constant 0 : index
    %57 = vector.load %arg12[%c0_40, %c0_41] : memref<64x32xf32, #tpu.memory_space<vmem>>, vector<64x32xf32>
    %cst_42 = arith.constant dense<0.000000e+00> : vector<4x32xf32>
    %58 = tpu.matmul %56, %57, %cst_42 {dimension_numbers = #tpu.dot_dimension_numbers<[1], [0], [0], [1], [0, 0, 1, 1], [], []>} : vector<4x64xf32>, vector<64x32xf32>, vector<4x32xf32> -> vector<4x32xf32>
    %c0_43 = arith.constant 0 : index
    %c0_44 = arith.constant 0 : index
    %59 = vector.load %arg13[%c0_43, %c0_44] : memref<1x32xf32, #tpu.memory_space<vmem>>, vector<1x32xf32>
    %60 = vector.broadcast %59 : vector<1x32xf32> to vector<4x32xf32>
    %61 = arith.addf %58, %60 : vector<4x32xf32>
    %c0_45 = arith.constant 0 : index
    %c0_46 = arith.constant 0 : index
    %62 = vector.load %arg14[%c0_45, %c0_46] : memref<32x160xf32, #tpu.memory_space<vmem>>, vector<32x160xf32>
    %cst_47 = arith.constant dense<0.000000e+00> : vector<4x160xf32>
    %63 = tpu.matmul %61, %62, %cst_47 {dimension_numbers = #tpu.dot_dimension_numbers<[1], [0], [0], [1], [0, 0, 1, 1], [], []>} : vector<4x32xf32>, vector<32x160xf32>, vector<4x160xf32> -> vector<4x160xf32>
    %c0_48 = arith.constant 0 : index
    %c0_49 = arith.constant 0 : index
    %64 = vector.load %arg15[%c0_48, %c0_49] : memref<3x160xf32, #tpu.memory_space<vmem>>, vector<3x160xf32>
    %c0_50 = arith.constant 0 : index
    %c0_51 = arith.constant 0 : index
    %65 = vector.load %arg16[%c0_50, %c0_51] : memref<160x160xf32, #tpu.memory_space<vmem>>, vector<160x160xf32>
    %cst_52 = arith.constant dense<0.000000e+00> : vector<3x160xf32>
    %66 = tpu.matmul %64, %65, %cst_52 {dimension_numbers = #tpu.dot_dimension_numbers<[1], [0], [0], [1], [0, 0, 1, 1], [], []>} : vector<3x160xf32>, vector<160x160xf32>, vector<3x160xf32> -> vector<3x160xf32>
    %c0_53 = arith.constant 0 : index
    %c0_54 = arith.constant 0 : index
    %67 = vector.load %arg17[%c0_53, %c0_54] : memref<1x160xf32, #tpu.memory_space<vmem>>, vector<1x160xf32>
    %c0_55 = arith.constant 0 : index
    %c0_56 = arith.constant 0 : index
    %68 = vector.load %arg18[%c0_55, %c0_56] : memref<160x5xf32, #tpu.memory_space<vmem>>, vector<160x5xf32>
    %c0_57 = arith.constant 0 : index
    %c0_58 = arith.constant 0 : index
    %69 = vector.load %arg19[%c0_57, %c0_58] : memref<1x5xf32, #tpu.memory_space<vmem>>, vector<1x5xf32>
    %70 = vector.extract_strided_slice %66 {offsets = [0, 0], sizes = [1, 160], strides = [1, 1]} : vector<3x160xf32> to vector<1x160xf32>
    %71 = vector.broadcast %70 : vector<1x160xf32> to vector<4x160xf32>
    %72 = arith.addf %63, %71 : vector<4x160xf32>
    %73 = vector.broadcast %67 : vector<1x160xf32> to vector<4x160xf32>
    %74 = arith.addf %72, %73 : vector<4x160xf32>
    %75 = math.tanh %74 : vector<4x160xf32>
    %cst_59 = arith.constant dense<0.000000e+00> : vector<4x5xf32>
    %76 = tpu.matmul %75, %68, %cst_59 {dimension_numbers = #tpu.dot_dimension_numbers<[1], [0], [0], [1], [0, 0, 1, 1], [], []>} : vector<4x160xf32>, vector<160x5xf32>, vector<4x5xf32> -> vector<4x5xf32>
    %77 = vector.broadcast %69 : vector<1x5xf32> to vector<4x5xf32>
    %78 = arith.addf %76, %77 : vector<4x5xf32>
    %79 = vector.extract_strided_slice %66 {offsets = [1, 0], sizes = [1, 160], strides = [1, 1]} : vector<3x160xf32> to vector<1x160xf32>
    %80 = vector.broadcast %79 : vector<1x160xf32> to vector<4x160xf32>
    %81 = arith.addf %63, %80 : vector<4x160xf32>
    %82 = vector.broadcast %67 : vector<1x160xf32> to vector<4x160xf32>
    %83 = arith.addf %81, %82 : vector<4x160xf32>
    %84 = math.tanh %83 : vector<4x160xf32>
    %cst_60 = arith.constant dense<0.000000e+00> : vector<4x5xf32>
    %85 = tpu.matmul %84, %68, %cst_60 {dimension_numbers = #tpu.dot_dimension_numbers<[1], [0], [0], [1], [0, 0, 1, 1], [], []>} : vector<4x160xf32>, vector<160x5xf32>, vector<4x5xf32> -> vector<4x5xf32>
    %86 = vector.broadcast %69 : vector<1x5xf32> to vector<4x5xf32>
    %87 = arith.addf %85, %86 : vector<4x5xf32>
    %88 = vector.extract_strided_slice %66 {offsets = [2, 0], sizes = [1, 160], strides = [1, 1]} : vector<3x160xf32> to vector<1x160xf32>
    %89 = vector.broadcast %88 : vector<1x160xf32> to vector<4x160xf32>
    %90 = arith.addf %63, %89 : vector<4x160xf32>
    %91 = vector.broadcast %67 : vector<1x160xf32> to vector<4x160xf32>
    %92 = arith.addf %90, %91 : vector<4x160xf32>
    %93 = math.tanh %92 : vector<4x160xf32>
    %cst_61 = arith.constant dense<0.000000e+00> : vector<4x5xf32>
    %94 = tpu.matmul %93, %68, %cst_61 {dimension_numbers = #tpu.dot_dimension_numbers<[1], [0], [0], [1], [0, 0, 1, 1], [], []>} : vector<4x160xf32>, vector<160x5xf32>, vector<4x5xf32> -> vector<4x5xf32>
    %95 = vector.broadcast %69 : vector<1x5xf32> to vector<4x5xf32>
    %96 = arith.addf %94, %95 : vector<4x5xf32>
    %97 = arith.maximumf %78, %87 : vector<4x5xf32>
    %98 = arith.maximumf %97, %96 : vector<4x5xf32>
    %99 = arith.subf %78, %98 : vector<4x5xf32>
    %100 = math.exp %99 : vector<4x5xf32>
    %101 = arith.subf %87, %98 : vector<4x5xf32>
    %102 = math.exp %101 : vector<4x5xf32>
    %103 = arith.subf %96, %98 : vector<4x5xf32>
    %104 = math.exp %103 : vector<4x5xf32>
    %105 = arith.addf %100, %102 : vector<4x5xf32>
    %106 = arith.addf %105, %104 : vector<4x5xf32>
    %107 = tpu.reciprocal %106 {approx = true} : vector<4x5xf32> -> vector<4x5xf32>
    %108 = arith.mulf %100, %107 : vector<4x5xf32>
    %109 = vector.shape_cast %108 : vector<4x5xf32> to vector<4x5x1xf32>
    %c0_62 = arith.constant 0 : index
    %c0_63 = arith.constant 0 : index
    %c0_64 = arith.constant 0 : index
    %110 = vector.load %arg20[%c0_62, %c0_63, %c0_64] : memref<3x5x32xf32, #tpu.memory_space<vmem>>, vector<1x5x32xf32>
    %111 = vector.shape_cast %110 : vector<1x5x32xf32> to vector<5x32xf32>
    %112 = vector.shape_cast %111 : vector<5x32xf32> to vector<1x5x32xf32>
    %113 = vector.broadcast %109 : vector<4x5x1xf32> to vector<4x5x32xf32>
    %114 = vector.broadcast %112 : vector<1x5x32xf32> to vector<4x5x32xf32>
    %115 = arith.mulf %113, %114 : vector<4x5x32xf32>
    %116 = arith.mulf %102, %107 : vector<4x5xf32>
    %117 = vector.shape_cast %116 : vector<4x5xf32> to vector<4x5x1xf32>
    %c1 = arith.constant 1 : index
    %c0_65 = arith.constant 0 : index
    %c0_66 = arith.constant 0 : index
    %118 = vector.load %arg20[%c1, %c0_65, %c0_66] : memref<3x5x32xf32, #tpu.memory_space<vmem>>, vector<1x5x32xf32>
    %119 = vector.shape_cast %118 : vector<1x5x32xf32> to vector<5x32xf32>
    %120 = vector.shape_cast %119 : vector<5x32xf32> to vector<1x5x32xf32>
    %121 = vector.broadcast %117 : vector<4x5x1xf32> to vector<4x5x32xf32>
    %122 = vector.broadcast %120 : vector<1x5x32xf32> to vector<4x5x32xf32>
    %123 = arith.mulf %121, %122 : vector<4x5x32xf32>
    %124 = arith.addf %115, %123 : vector<4x5x32xf32>
    %125 = arith.mulf %104, %107 : vector<4x5xf32>
    %126 = vector.shape_cast %125 : vector<4x5xf32> to vector<4x5x1xf32>
    %c2 = arith.constant 2 : index
    %c0_67 = arith.constant 0 : index
    %c0_68 = arith.constant 0 : index
    %127 = vector.load %arg20[%c2, %c0_67, %c0_68] : memref<3x5x32xf32, #tpu.memory_space<vmem>>, vector<1x5x32xf32>
    %128 = vector.shape_cast %127 : vector<1x5x32xf32> to vector<5x32xf32>
    %129 = vector.shape_cast %128 : vector<5x32xf32> to vector<1x5x32xf32>
    %130 = vector.broadcast %126 : vector<4x5x1xf32> to vector<4x5x32xf32>
    %131 = vector.broadcast %129 : vector<1x5x32xf32> to vector<4x5x32xf32>
    %132 = arith.mulf %130, %131 : vector<4x5x32xf32>
    %133 = arith.addf %124, %132 : vector<4x5x32xf32>
    %134 = vector.shape_cast %61 : vector<4x32xf32> to vector<4x1x32xf32>
    %135 = vector.broadcast %134 : vector<4x1x32xf32> to vector<4x5x32xf32>
    %136 = arith.subf %135, %133 : vector<4x5x32xf32>
    %137 = arith.mulf %136, %136 : vector<4x5x32xf32>
    %cst_69 = arith.constant dense<0.000000e+00> : vector<4x5xf32>
    %138 = vector.multi_reduction <add>, %137, %cst_69 [2] : vector<4x5x32xf32> to vector<4x5xf32>
    %139 = math.sqrt %138 : vector<4x5xf32>
    %cst_70 = arith.constant 0.000000e+00 : f32
    %140 = vector.broadcast %cst_70 : f32 to vector<4x5xf32>
    %141 = arith.subf %140, %139 : vector<4x5xf32>
    %c0_71 = arith.constant 0 : index
    %c0_72 = arith.constant 0 : index
    %142 = vector.load %arg21[%c0_71, %c0_72] : memref<1x1xf32, #tpu.memory_space<vmem>>, vector<1x1xf32>
    %143 = vector.broadcast %142 : vector<1x1xf32> to vector<4x5xf32>
    %144 = arith.mulf %141, %143 : vector<4x5xf32>
    %c0_73 = arith.constant 0 : index
    %c0_74 = arith.constant 0 : index
    %145 = vector.load %arg22[%c0_73, %c0_74] : memref<4x5xf32, #tpu.memory_space<vmem>>, vector<4x5xf32>
    tpu.vector_store %arg22[%c0_73, %c0_74], %144 {strides = array<i32>} : memref<4x5xf32, #tpu.memory_space<vmem>>, vector<4x5xf32>,
    return
  }
}

</mosaic_0001>

<bundles_post_ra>
// kernel: whisper_encoder_forward.1
= control target key start
LH: loop header
LB: loop body
LE: loop exit
PB: predicated region body
PF: predicated region fallthrough
CT: control target
= control target key end

     0   :  { %s3913_s0 = inlined_call_operand.vmem [shape: f32[64,32], index: 0, kind: input, shape index: {}]   ;;  %s3914_s1 = inlined_call_operand.vmem [shape: f32[32,16], index: 1, kind: input, shape index: {}]   ;;  %s3915_s2 = inlined_call_operand.vmem [shape: f32[64,64], index: 2, kind: input, shape index: {}]   ;;  %s3916_s3 = inlined_call_operand.vmem [shape: f32[64,64], index: 3, kind: input, shape index: {}]   ;;  %s3917_s4 = inlined_call_operand.vmem [shape: f32[48,64], index: 4, kind: input, shape index: {}]   ;;  %s3918_s5 = inlined_call_operand.vmem [shape: f32[1,64], index: 5, kind: input, shape index: {}]   ;;  %s3919_s6 = inlined_call_operand.vmem [shape: f32[32,64], index: 6, kind: input, shape index: {}]   ;;  %s3920_s7 = inlined_call_operand.vmem [shape: f32[32,64], index: 7, kind: input, shape index: {}]   ;;  %s3921_s8 = inlined_call_operand.vmem [shape: f32[32,64], index: 8, kind: input, shape index: {}]   ;;  %s3922_s9 = inlined_call_operand.vmem [shape: f32[192,64], index: 9, kind: input, shape index: {}]   ;;  %s3923_s10 = inlined_call_operand.vmem [shape: f32[1,64], index: 10, kind: input, shape index: {}]   ;;  %s3924_s11 = inlined_call_operand.vmem [shape: f32[4,32], index: 11, kind: input, shape index: {}]   ;;  %s3925_s12 = inlined_call_operand.vmem [shape: f32[64,32], index: 12, kind: input, shape index: {}]   ;;  %s3926_s13 = inlined_call_operand.vmem [shape: f32[1,32], index: 13, kind: input, shape index: {}]   ;;  %s3927_s14 = inlined_call_operand.vmem [shape: f32[32,160], index: 14, kind: input, shape index: {}]   ;;  %s3928_s15 = inlined_call_operand.vmem [shape: f32[3,160], index: 15, kind: input, shape index: {}]   ;;  %s3929_s16 = inlined_call_operand.vmem [shape: f32[160,160], index: 16, kind: input, shape index: {}]   ;;  %s3930_s17 = inlined_call_operand.vmem [shape: f32[1,160], index: 17, kind: input, shape index: {}]   ;;  %s3931_s18 = inlined_call_operand.vmem [shape: f32[160,5], index: 18, kind: input, shape index: {}]   ;;  %s3932_s19 = inlined_call_operand.vmem [shape: f32[1,5], index: 19, kind: input, shape index: {}]   ;;  %s3933_s20 = inlined_call_operand.vmem [shape: f32[3,5,32], index: 20, kind: input, shape index: {}]   ;;  %s3934_s21 = inlined_call_operand.<no memory space> [shape: f32[1,1], index: 21, kind: input, shape index: {}]   ;;  %s3935_s22 = inlined_call_operand.hbm [shape: f32[4,5], index: 22, kind: output, shape index: {}]  }
   0x1   :  { %3942 = sst [smem:[#allocation6_spill]] %s3913_s0  ;;  %v27_v0 = vstv %s3934_s21 }
   0x2   :  { %3943 = sst [smem:[#allocation7_spill]] %s3914_s1  ;;  %28 = vst [vmem:[#allocation2] sm:$0x1] %v27_v0 }
   0x3   :  { %3944 = sst [smem:[#allocation8_spill]] %s3915_s2 }
   0x4   :  { %3945 = sst [smem:[#allocation9_spill]] %s3916_s3 }
   0x5   :  { %3946 = sst [smem:[#allocation10_spill]] %s3917_s4 }
   0x6   :  { %3947 = sst [smem:[#allocation11_spill]] %s3918_s5 }
   0x7   :  { %3948 = sst [smem:[#allocation12_spill]] %s3919_s6 }
   0x8   :  { %s3949_s4 = sld [smem:[#allocation7_spill]]  ;;  %vm86_vm0 = vcmask 261120   ;;  %s3950_s26 = sld [smem:[#allocation6_spill]] }
   0xe   :  { %v82_v1 = vld [vmem:[%s3949_s4] sm:$0xff]  ;;  %v83_v2 = vld [vmem:[%s3949_s4 + $0x8] sm:$0xff]  ;;  %v84_v3 = vld [vmem:[%s3949_s4 + $0x10] sm:$0xff] }
   0xf   :  { %v2614_v4 = vpack.c.bf16 %v83_v2, %v82_v1  ;;  %v85_v5 = vld [vmem:[%s3949_s4 + $0x18] sm:$0xff]  ;;  %v74_v6 = vld [vmem:[%s3950_s26] sm:$0xff] }
  0x10   :  { %v2618_v7 = vpack.c.bf16 %v85_v5, %v84_v3  ;;  %2426 = vmatprep.mubr.msk.f32.mxu0 %vm86_vm0, %v74_v6 }
  0x11   :  { %2615 = vmatprep.subr.bf16.mxu0 %v2614_v4 }
  0x12   :  { %2617 = vmatpush3.bf16.msra.mxu0 %v2614_v4 }
  0x13   :  { %29 = vsyncpa [#allocation4], 0  ;;  %2619 = vmatprep.subr.bf16.mxu0 %v2618_v7  ;;  %v75_v8 = vld [vmem:[%s3950_s26 + $0x8] sm:$0xff]  ;;  %v76_v9 = vld [vmem:[%s3950_s26 + $0x10] sm:$0xff]  ;;  %s3951_s27 = sld [smem:[#allocation8_spill]]  ;;  %vm256_vm1 = vcmask 523264  }
  0x14   :  { %v77_v10 = vld [vmem:[%s3950_s26 + $0x18] sm:$0xff]  ;;  %v78_v11 = vld [vmem:[%s3950_s26 + $0x20] sm:$0xff]  ;;  %v79_v12 = vld [vmem:[%s3950_s26 + $0x28] sm:$0xff]  ;;  %s3952_s29 = sld [smem:[#allocation9_spill]]  ;;  %s3953_s1 = sld [smem:[#allocation10_spill]]  ;;  %vm587_vm2 = vcmask 130048  }
  0x15   :  { %v80_v13 = vld [vmem:[%s3950_s26 + $0x30] sm:$0xff]  ;;  %v81_v14 = vld [vmem:[%s3950_s26 + $0x38] sm:$0xff]  ;;  %s3010_s26 = smov 16   ;;  %s3011_s30 = smov 32   ;;  %vm617_vm3 = vcmask 392192   ;;  %vm3014_vm4 = vmmov 0  }
  0x16   :  { %2621 = vmatpush3.bf16.msra.mxu0 %v2618_v7  ;;  %s3955_s6 = sld [smem:[#allocation11_spill]]  ;;  %vm2144_vm5 = vcmask 258048   ;;  %vm2225_vm14 = vcmask 1041409   ;;  %vm2227_vm15 = vcmask 1042434  }
  0x19   :  { %2427 = vmatmul.mubr.msk.f32.vlgmr.msra.gmra.mrb[0].mxu0 %vm86_vm0, %v75_v8  ;;  %v248_v15 = vld [vmem:[%s3951_s27] sm:$0xff]  ;;  %v249_v61 = vld [vmem:[%s3951_s27 + $0x8] sm:$0xff]  ;;  %v250_v63 = vld [vmem:[%s3951_s27 + $0x10] sm:$0xff] }
  0x1a   :  { %2429 = vmatprep.mubr.msk.f32.mxu0 %vm86_vm0, %v76_v9  ;;  %v386_v16 = vld [vmem:[%s3952_s29] sm:$0xff]  ;;  %2454 = vmatprep.mubr.msk.f32.mxu1 %vm256_vm1, %v248_v15  ;;  %v387_v62 = vld [vmem:[%s3952_s29 + $0x8] sm:$0xff]  ;;  %v388_v0 = vld [vmem:[%s3952_s29 + $0x10] sm:$0xff] }
  0x1b   :  { %v251_v1 = vld [vmem:[%s3951_s27 + $0x18] sm:$0xff]  ;;  %v252_v3 = vld [vmem:[%s3951_s27 + $0x20] sm:$0xff]  ;;  %v253_v5 = vld [vmem:[%s3951_s27 + $0x28] sm:$0xff] }
  0x1c   :  { %v389_v2 = vld [vmem:[%s3952_s29 + $0x18] sm:$0xff]  ;;  %v390_v4 = vld [vmem:[%s3952_s29 + $0x20] sm:$0xff]  ;;  %v391_v6 = vld [vmem:[%s3952_s29 + $0x28] sm:$0xff] }
  0x1d   :  { %2430 = vmatmul.mubr.msk.f32.gmra.mrb[2].mxu0 %vm86_vm0, %v77_v10  ;;  %v254_v7 = vld [vmem:[%s3951_s27 + $0x30] sm:$0xff]  ;;  %v255_v9 = vld [vmem:[%s3951_s27 + $0x38] sm:$0xff] }
  0x1e   :  { %2432 = vmatprep.mubr.msk.f32.mxu0 %vm86_vm0, %v78_v11  ;;  %v392_v8 = vld [vmem:[%s3952_s29 + $0x30] sm:$0xff]  ;;  %v393_v10 = vld [vmem:[%s3952_s29 + $0x38] sm:$0xff]  ;;  %v604_v11 = vld [vmem:[%s3953_s1] sm:$0xff] }
  0x1f   :  { %v607_v15 = vld [vmem:[%s3953_s1 + $0x18] sm:$0xff] }
  0x21   :  { %2433 = vmatmul.mubr.msk.f32.gmra.mrb[4].mxu0 %vm86_vm0, %v79_v12  ;;  %v605_v12 = vld [vmem:[%s3953_s1 + $0x8] sm:$0xff] }
  0x22   :  { %2435 = vmatprep.mubr.msk.f32.mxu0 %vm86_vm0, %v80_v13  ;;  %v606_v13 = vld [vmem:[%s3953_s1 + $0x10] sm:$0xff] }
  0x25   :  { %2436 = vmatmul.mubr.msk.f32.gmra.mrb[6].mxu0 %vm86_vm0, %v81_v14  ;;  %v2654_v14 = vpack.c.bf16 %v605_v12, %v604_v11 }
  0x26   :  { %2482 = vmatprep.mubr.msk.f32.mxu0 %vm256_vm1, %v386_v16  ;;  %v2658_v16 = vpack.c.bf16 %v607_v15, %v606_v13 }
  0xec   :  { %v2428_v17 = vpop.f32.mrb[0].mxu0 }
  0xed   :  { %v217_v18 = vand.u32 2147483647, %v2428_v17  ;;  %v177_v19 = vpop.f32.mrb[1].mxu0  ;;  %v608_v17 = vld [vmem:[%s3953_s1 + $0x20] sm:$0xff] }
  0xee   :  { %v216_v20 = vand.u32 2147483647, %v177_v19 }
  0xef   :  { %v225_v21 = vadd.f32 1.0, %v217_v18  ;;  %v609_v18 = vld [vmem:[%s3953_s1 + $0x28] sm:$0xff]  ;;  %s3954_s1 = sld [smem:[#allocation12_spill]] }
  0xf0   :  { %v224_v22 = vadd.f32 1.0, %v216_v20  ;;  %v2431_v23 = vpop.f32.mrb[2].mxu0  ;;  %v2662_v19 = vpack.c.bf16 %v609_v18, %v608_v17 }
  0xf1   :  { %2918 = vlog2.f32 %v225_v21  ;;  %v219_v24 = vand.u32 2147483647, %v2431_v23  ;;  %v187_v25 = vpop.f32.mrb[3].mxu0 }
  0xf2   :  { %2920 = vlog2.f32 %v224_v22  ;;  %v218_v26 = vand.u32 2147483647, %v187_v25 }
  0xf3   :  { %v227_v27 = vadd.f32 1.0, %v219_v24 }
  0xf4   :  { %v226_v28 = vadd.f32 1.0, %v218_v26  ;;  %v2434_v29 = vpop.f32.mrb[4].mxu0 }
  0xf5   :  { %2922 = vlog2.f32 %v227_v27  ;;  %v221_v30 = vand.u32 2147483647, %v2434_v29  ;;  %v197_v31 = vpop.f32.mrb[5].mxu0 }
  0xf6   :  { %2924 = vlog2.f32 %v226_v28  ;;  %v220_v32 = vand.u32 2147483647, %v197_v31 }
  0xf7   :  { %v229_v33 = vadd.f32 1.0, %v221_v30 }
  0xf8   :  { %v228_v34 = vadd.f32 1.0, %v220_v32  ;;  %v2437_v35 = vpop.f32.mrb[6].mxu0 }
  0xf9   :  { %2926 = vlog2.f32 %v229_v33  ;;  %v223_v36 = vand.u32 2147483647, %v2437_v35  ;;  %v207_v37 = vpop.f32.mrb[7].mxu0 }
  0xfa   :  { %2928 = vlog2.f32 %v228_v34  ;;  %v222_v38 = vand.u32 2147483647, %v207_v37 }
  0xfb   :  { %v2919_v39 = vpop.eup %2918  ;;  %v231_v40 = vadd.f32 1.0, %v223_v36 }
  0xfc   :  { %v2921_v41 = vpop.eup %2920  ;;  %v230_v42 = vadd.f32 1.0, %v222_v38  ;;  %v235_v43 = vmul.f32 0.6931472, %v2919_v39 }
  0xfd   :  { %v233_v44 = vmul.f32 0.6931472, %v2921_v41  ;;  %2930 = vlog2.f32 %v231_v40 }
  0xfe   :  { %2932 = vlog2.f32 %v230_v42  ;;  %533 = vrot.lane.b32.xlu0 %v235_v43, %s3010_s26 }
  0xff   :  { %v2923_v45 = vpop.eup %2922  ;;  %v2622_v46 = vpack.c.bf16 %v235_v43, %v233_v44 }
 0x100   :  { %v2925_v47 = vpop.eup %2924  ;;  %v239_v48 = vmul.f32 0.6931472, %v2923_v45 }
 0x101   :  { %v237_v49 = vmul.f32 0.6931472, %v2925_v47  ;;  %2623 = vmatprep.subr.bf16.mxu1 %v2622_v46  ;;  %2639 = vmatprep.subr.bf16.mxu0 %v2622_v46 }
 0x102   :  { %531 = vrot.lane.b32.xlu0 %v233_v44, %s3010_s26  ;;  %2625 = vmatpush3.bf16.msra.mxu1 %v2622_v46 }
 0x103   :  { %v2927_v50 = vpop.eup %2926  ;;  %2641 = vmatpush3.bf16.msra.mxu0 %v2622_v46  ;;  %537 = vrot.lane.b32.xlu1 %v239_v48, %s3010_s26  ;;  %v2626_v51 = vpack.c.bf16 %v239_v48, %v237_v49 }
 0x104   :  { %v2929_v52 = vpop.eup %2928  ;;  %v243_v53 = vmul.f32 0.6931472, %v2927_v50 }
 0x105   :  { %v241_v54 = vmul.f32 0.6931472, %v2929_v52  ;;  %2627 = vmatprep.subr.bf16.mxu1 %v2626_v51  ;;  %2643 = vmatprep.subr.bf16.mxu0 %v2626_v51 }
 0x106   :  { %535 = vrot.lane.b32.xlu0 %v237_v49, %s3010_s26  ;;  %2629 = vmatpush3.bf16.msra.mxu1 %v2626_v51 }
 0x107   :  { %v2931_v55 = vpop.eup %2930  ;;  %2645 = vmatpush3.bf16.msra.mxu0 %v2626_v51  ;;  %541 = vrot.lane.b32.xlu1 %v243_v53, %s3010_s26  ;;  %v2630_v56 = vpack.c.bf16 %v243_v53, %v241_v54 }
 0x108   :  { %v2933_v57 = vpop.eup %2932  ;;  %v3194_v58 = vmul.f32 0.6931472, %v2931_v55 }
 0x109   :  { %v245_v59 = vmul.f32 0.6931472, %v2933_v57  ;;  %2631 = vmatprep.subr.bf16.mxu1 %v2630_v56  ;;  %2647 = vmatprep.subr.bf16.mxu0 %v2630_v56 }
 0x10a   :  { %539 = vrot.lane.b32.xlu0 %v241_v54, %s3010_s26  ;;  %2633 = vmatpush3.bf16.msra.mxu1 %v2630_v56 }
 0x10b   :  { %v2634_v60 = vpack.c.bf16 %v3194_v58, %v245_v59  ;;  %2649 = vmatpush3.bf16.msra.mxu0 %v2630_v56 }
 0x10d   :  { %2635 = vmatprep.subr.bf16.mxu1 %v2634_v60  ;;  %2651 = vmatprep.subr.bf16.mxu0 %v2634_v60 }
 0x10e   :  { %543 = vrot.lane.b32.xlu0 %v245_v59, %s3010_s26  ;;  %2637 = vmatpush3.bf16.msra.mxu1 %v2634_v60 }
 0x10f   :  { %2653 = vmatpush3.bf16.msra.mxu0 %v2634_v60  ;;  %2655 = vmatprep.subr.bf16.mxu1 %v2654_v14 }
 0x111   :  { %2455 = vmatmul.mubr.msk.f32.vlgmr.msra.gmra.mrb[0].mxu1 %vm256_vm1, %v249_v61 }
 0x112   :  { %2483 = vmatmul.mubr.msk.f32.vlgmr.msra.gmra.mrb[8].mxu0 %vm256_vm1, %v387_v62  ;;  %2457 = vmatprep.mubr.msk.f32.mxu1 %vm256_vm1, %v250_v63 }
 0x113   :  { %2485 = vmatprep.mubr.msk.f32.mxu0 %vm256_vm1, %v388_v0  ;;  %2657 = vmatpush3.bf16.msra.mxu1 %v2654_v14 }
 0x114   :  { %2659 = vmatprep.subr.bf16.mxu1 %v2658_v16 }
 0x115   :  { %2458 = vmatmul.mubr.msk.f32.gmra.mrb[2].mxu1 %vm256_vm1, %v251_v1 }
 0x116   :  { %2486 = vmatmul.mubr.msk.f32.gmra.mrb[10].mxu0 %vm256_vm1, %v389_v2  ;;  %2460 = vmatprep.mubr.msk.f32.mxu1 %vm256_vm1, %v252_v3 }
 0x117   :  { %2488 = vmatprep.mubr.msk.f32.mxu0 %vm256_vm1, %v390_v4  ;;  %2661 = vmatpush3.bf16.msra.mxu1 %v2658_v16  ;;  %v920_v4 = vld [vmem:[%s3920_s7] sm:$0xff] }
 0x118   :  { %2663 = vmatprep.subr.bf16.mxu1 %v2662_v19 }
 0x119   :  { %2461 = vmatmul.mubr.msk.f32.gmra.mrb[4].mxu1 %vm256_vm1, %v253_v5  ;;  %v819_v5 = vld [vmem:[%s3954_s1] sm:$0xff] }
 0x11a   :  { %2489 = vmatmul.mubr.msk.f32.gmra.mrb[12].mxu0 %vm256_vm1, %v391_v6  ;;  %2463 = vmatprep.mubr.msk.f32.mxu1 %vm256_vm1, %v254_v7  ;;  %v2272_v6 = vld [vmem:[%s3955_s6] ss:$0 sm:$0xff] }
 0x11b   :  { %2491 = vmatprep.mubr.msk.f32.mxu0 %vm256_vm1, %v392_v8  ;;  %2665 = vmatpush3.bf16.msra.mxu1 %v2662_v19 }
 0x11d   :  { %2464 = vmatmul.mubr.msk.f32.gmra.mrb[6].mxu1 %vm256_vm1, %v255_v9 }
 0x11e   :  { %2492 = vmatmul.mubr.msk.f32.gmra.mrb[14].mxu0 %vm256_vm1, %v393_v10 }
 0x11f   :  { %2534 = vmatprep.mubr.msk.f32.mxu0 %vm256_vm1, %v819_v5 }
 0x170   :  { %v534_v36 = vpop.permute.xlu0 %533 }
 0x174   :  { %v532_v37 = vpop.permute.xlu0 %531 }
 0x175   :  { %v538_v39 = vpop.permute.xlu1 %537 }
 0x178   :  { %v536_v38 = vpop.permute.xlu0 %535 }
 0x179   :  { %v542_v41 = vpop.permute.xlu1 %541 }
 0x17c   :  { %v540_v40 = vpop.permute.xlu0 %539 }
 0x180   :  { %v544_v43 = vpop.permute.xlu0 %543 }
 0x1e4   :  { %v2456_v20 = vpop.f32.mrb[0].mxu1 }
 0x1e5   :  { %v2484_v21 = vpop.f32.mrb[8].mxu0  ;;  %v347_v22 = vpop.f32.mrb[1].mxu1  ;;  %v589_v46 = vsel %vm587_vm2, %v2456_v20, %v534_v36 }
 0x1e6   :  { %565 = vrot.lane.b32.xlu1 %v2484_v21, %s3011_s30  ;;  %v484_v23 = vpop.f32.mrb[9].mxu0  ;;  %v588_v44 = vsel %vm587_vm2, %v347_v22, %v532_v37 }
 0x1e8   :  { %v2459_v24 = vpop.f32.mrb[2].mxu1 }
 0x1e9   :  { %v2487_v25 = vpop.f32.mrb[10].mxu0  ;;  %v357_v26 = vpop.f32.mrb[3].mxu1  ;;  %v591_v54 = vsel %vm587_vm2, %v2459_v24, %v538_v39 }
 0x1ea   :  { %563 = vrot.lane.b32.xlu1 %v484_v23, %s3011_s30  ;;  %v494_v27 = vpop.f32.mrb[11].mxu0  ;;  %v590_v47 = vsel %vm587_vm2, %v357_v26, %v536_v38 }
 0x1eb   :  { %567 = vrot.lane.b32.xlu0 %v494_v27, %s3011_s30 }
 0x1ec   :  { %v2462_v28 = vpop.f32.mrb[4].mxu1 }
 0x1ed   :  { %v2490_v29 = vpop.f32.mrb[12].mxu0  ;;  %v367_v30 = vpop.f32.mrb[5].mxu1  ;;  %v593_v60 = vsel %vm587_vm2, %v2462_v28, %v542_v41 }
 0x1ee   :  { %545 = vrot.lane.b32.xlu1 %v3194_v58, %s3010_s26  ;;  %v504_v31 = vpop.f32.mrb[13].mxu0  ;;  %v592_v56 = vsel %vm587_vm2, %v367_v30, %v540_v40 }
 0x1ef   :  { %571 = vrot.lane.b32.xlu0 %v504_v31, %s3011_s30 }
 0x1f0   :  { %v2465_v32 = vpop.f32.mrb[6].mxu1 }
 0x1f1   :  { %v2493_v33 = vpop.f32.mrb[14].mxu0  ;;  %v377_v34 = vpop.f32.mrb[7].mxu1 }
 0x1f2   :  { %569 = vrot.lane.b32.xlu1 %v2487_v25, %s3011_s30  ;;  %v514_v35 = vpop.f32.mrb[15].mxu0  ;;  %v594_v62 = vsel %vm587_vm2, %v377_v34, %v544_v43 }
 0x1f3   :  { %575 = vrot.lane.b32.xlu0 %v514_v35, %s3011_s30 }
 0x1f6   :  { %573 = vrot.lane.b32.xlu1 %v2490_v29, %s3011_s30 }
 0x1fa   :  { %577 = vrot.lane.b32.xlu1 %v2493_v33, %s3011_s30 }
 0x258   :  { %v566_v42 = vpop.permute.xlu1 %565 }
 0x259   :  { %v597_v50 = vsel %vm86_vm0, %v589_v46, %v566_v42 }
 0x25c   :  { %v564_v45 = vpop.permute.xlu1 %563 }
 0x25d   :  { %v596_v48 = vsel %vm86_vm0, %v588_v44, %v564_v45  ;;  %v568_v49 = vpop.permute.xlu0 %567 }
 0x25e   :  { %v598_v51 = vsel %vm86_vm0, %v590_v47, %v568_v49  ;;  %2506 = vmatprep.mubr.msk.f32.mxu1 %vm617_vm3, %v596_v48 }
 0x25f   :  { %2507 = vmatmul.mubr.msk.f32.vlgmr.msra.gmra.mrb[8].mxu1 %vm617_vm3, %v597_v50 }
 0x260   :  { %v546_v52 = vpop.permute.xlu1 %545  ;;  %2509 = vmatprep.mubr.msk.f32.mxu1 %vm617_vm3, %v598_v51 }
 0x261   :  { %v572_v53 = vpop.permute.xlu0 %571  ;;  %v595_v1 = vsel %vm587_vm2, %v2465_v32, %v546_v52 }
 0x262   :  { %v600_v58 = vsel %vm86_vm0, %v592_v56, %v572_v53 }
 0x264   :  { %v570_v55 = vpop.permute.xlu1 %569 }
 0x265   :  { %v599_v57 = vsel %vm86_vm0, %v591_v54, %v570_v55  ;;  %v576_v59 = vpop.permute.xlu0 %575 }
 0x266   :  { %2510 = vmatmul.mubr.msk.f32.gmra.mrb[10].mxu1 %vm617_vm3, %v599_v57  ;;  %v602_v0 = vsel %vm86_vm0, %v594_v62, %v576_v59 }
 0x267   :  { %2512 = vmatprep.mubr.msk.f32.mxu1 %vm617_vm3, %v600_v58 }
 0x268   :  { %v574_v61 = vpop.permute.xlu1 %573 }
 0x269   :  { %v601_v63 = vsel %vm86_vm0, %v593_v60, %v574_v61 }
 0x26a   :  { %2513 = vmatmul.mubr.msk.f32.gmra.mrb[12].mxu1 %vm617_vm3, %v601_v63 }
 0x26b   :  { %2515 = vmatprep.mubr.msk.f32.mxu1 %vm617_vm3, %v602_v0 }
 0x26c   :  { %v578_v2 = vpop.permute.xlu1 %577 }
 0x26d   :  { %v603_v3 = vsel %vm86_vm0, %v595_v1, %v578_v2 }
 0x26e   :  { %2516 = vmatmul.mubr.msk.f32.gmra.mrb[14].mxu1 %vm617_vm3, %v603_v3 }
 0x26f   :  { %2556 = vmatprep.mubr.msk.f32.mxu1 %vm256_vm1, %v920_v4 }
 0x332   :  { %v2508_v7 = vpop.f32.mrb[8].mxu1 }
 0x333   :  { %v3310_v8 = vadd.f32 %v2508_v7, %v2272_v6  ;;  %v708_v9 = vpop.f32.mrb[9].mxu1 }
 0x334   :  { %v3312_v10 = vadd.f32 %v2272_v6, %v708_v9 }
 0x335   :  { %v748_v11 = vmul.f32 %v3310_v8, %v3310_v8 }
 0x336   :  { %v747_v12 = vmul.f32 %v3312_v10, %v3312_v10 }
 0x337   :  { %v756_v13 = vmul.f32 %v748_v11, %v3310_v8 }
 0x338   :  { %v755_v14 = vmul.f32 %v747_v12, %v3312_v10 }
 0x339   :  { %v764_v15 = vmul.f32 0.044715, %v756_v13  ;;  %v2511_v16 = vpop.f32.mrb[10].mxu1 }
 0x33a   :  { %v763_v17 = vmul.f32 0.044715, %v755_v14  ;;  %v3320_v18 = vadd.f32 %v2511_v16, %v2272_v6  ;;  %v718_v19 = vpop.f32.mrb[11].mxu1 }
 0x33b   :  { %v772_v20 = vadd.f32 %v764_v15, %v3310_v8  ;;  %v3323_v21 = vadd.f32 %v2272_v6, %v718_v19 }
 0x33c   :  { %v771_v22 = vadd.f32 %v763_v17, %v3312_v10  ;;  %v750_v23 = vmul.f32 %v3320_v18, %v3320_v18 }
 0x33d   :  { %v780_v24 = vmul.f32 0.7978846, %v772_v20  ;;  %v749_v25 = vmul.f32 %v3323_v21, %v3323_v21  ;;  %v2514_v26 = vpop.f32.mrb[12].mxu1 }
 0x33e   :  { %v779_v27 = vmul.f32 0.7978846, %v771_v22  ;;  %v758_v28 = vmul.f32 %v750_v23, %v3320_v18  ;;  %v3331_v29 = vadd.f32 %v2514_v26, %v2272_v6  ;;  %v728_v30 = vpop.f32.mrb[13].mxu1 }
 0x33f   :  { %2934 = vtanh.f32 %v780_v24  ;;  %v757_v31 = vmul.f32 %v749_v25, %v3323_v21  ;;  %v3334_v32 = vadd.f32 %v2272_v6, %v728_v30 }
 0x340   :  { %2936 = vtanh.f32 %v779_v27  ;;  %v766_v33 = vmul.f32 0.044715, %v758_v28  ;;  %v752_v34 = vmul.f32 %v3331_v29, %v3331_v29 }
 0x341   :  { %v765_v35 = vmul.f32 0.044715, %v757_v31  ;;  %v751_v36 = vmul.f32 %v3334_v32, %v3334_v32  ;;  %v2517_v37 = vpop.f32.mrb[14].mxu1 }
 0x342   :  { %v774_v38 = vadd.f32 %v766_v33, %v3320_v18  ;;  %v760_v39 = vmul.f32 %v752_v34, %v3331_v29  ;;  %v3342_v40 = vadd.f32 %v2517_v37, %v2272_v6  ;;  %v738_v41 = vpop.f32.mrb[15].mxu1  ;;  %v922_v37 = vld [vmem:[%s3920_s7 + $0x10] sm:$0xff] }
 0x343   :  { %v773_v42 = vadd.f32 %v765_v35, %v3323_v21  ;;  %v759_v43 = vmul.f32 %v751_v36, %v3334_v32  ;;  %v3346_v44 = vadd.f32 %v2272_v6, %v738_v41  ;;  %v820_v36 = vld [vmem:[%s3954_s1 + $0x8] sm:$0xff]  ;;  %v1021_v41 = vld [vmem:[%s3921_s8] sm:$0xff] }
 0x344   :  { %v782_v45 = vmul.f32 0.7978846, %v774_v38  ;;  %v768_v46 = vmul.f32 0.044715, %v760_v39  ;;  %v754_v47 = vmul.f32 %v3342_v40, %v3342_v40  ;;  %v821_v38 = vld [vmem:[%s3954_s1 + $0x10] sm:$0xff]  ;;  %v923_v39 = vld [vmem:[%s3920_s7 + $0x18] sm:$0xff] }
 0x345   :  { %v781_v48 = vmul.f32 0.7978846, %v773_v42  ;;  %v767_v49 = vmul.f32 0.044715, %v759_v43  ;;  %v753_v50 = vmul.f32 %v3346_v44, %v3346_v44  ;;  %v1022_v42 = vld [vmem:[%s3921_s8 + $0x8] sm:$0xff]  ;;  %v1023_v43 = vld [vmem:[%s3921_s8 + $0x10] sm:$0xff] }
 0x346   :  { %2938 = vtanh.f32 %v782_v45  ;;  %v776_v51 = vadd.f32 %v768_v46, %v3331_v29  ;;  %v762_v52 = vmul.f32 %v754_v47, %v3342_v40  ;;  %v1142_v45 = vld [vmem:[%s3922_s9] sm:$0xff]  ;;  %v1143_v46 = vld [vmem:[%s3922_s9 + $0x8] sm:$0xff]  ;;  %v1144_v47 = vld [vmem:[%s3922_s9 + $0x10] sm:$0xff] }
 0x347   :  { %2940 = vtanh.f32 %v781_v48  ;;  %v775_v53 = vadd.f32 %v767_v49, %v3334_v32  ;;  %v761_v54 = vmul.f32 %v753_v50, %v3346_v44  ;;  %v3012_v48 = vmov 0.0|0.0   ;;  %v1145_v50 = vld [vmem:[%s3922_s9 + $0x18] sm:$0xff] }
 0x348   :  { %v784_v55 = vmul.f32 0.7978846, %v776_v51  ;;  %v770_v56 = vmul.f32 0.044715, %v762_v52  ;;  %v2715_v49 = vpack.c.bf16 %v1143_v46, %v1142_v45  ;;  %v2718_v51 = vpack.c.bf16 %v1145_v50, %v1144_v47  ;;  %v1146_v52 = vld [vmem:[%s3922_s9 + $0x20] sm:$0xff] }
 0x349   :  { %v2935_v57 = vpop.eup %2934  ;;  %v783_v58 = vmul.f32 0.7978846, %v775_v53  ;;  %v769_v59 = vmul.f32 0.044715, %v761_v54  ;;  %v1147_v53 = vld [vmem:[%s3922_s9 + $0x28] sm:$0xff] }
 0x34a   :  { %v2937_v60 = vpop.eup %2936  ;;  %v796_v61 = vadd.f32 1.0, %v2935_v57  ;;  %2942 = vtanh.f32 %v784_v55  ;;  %v778_v62 = vadd.f32 %v770_v56, %v3342_v40  ;;  %v2721_v54 = vpack.c.bf16 %v1147_v53, %v1146_v52  ;;  %v1148_v55 = vld [vmem:[%s3922_s9 + $0x30] sm:$0xff]  ;;  %v1149_v56 = vld [vmem:[%s3922_s9 + $0x38] sm:$0xff] }
 0x34b   :  { %v795_v63 = vadd.f32 1.0, %v2937_v60  ;;  %2944 = vtanh.f32 %v783_v58  ;;  %v777_v0 = vadd.f32 %v769_v59, %v3346_v44  ;;  %v2724_v57 = vpack.c.bf16 %v1149_v56, %v1148_v55  ;;  %v1150_v58 = vld [vmem:[%s3922_s9 + $0x40] sm:$0xff]  ;;  %v1151_v59 = vld [vmem:[%s3922_s9 + $0x48] sm:$0xff] }
 0x34c   :  { %v804_v1 = vmul.f32 0.5, %v796_v61  ;;  %v786_v2 = vmul.f32 0.7978846, %v778_v62  ;;  %v2727_v60 = vpack.c.bf16 %v1151_v59, %v1150_v58  ;;  %v1152_v61 = vld [vmem:[%s3922_s9 + $0x50] sm:$0xff]  ;;  %v1153_v62 = vld [vmem:[%s3922_s9 + $0x58] sm:$0xff] }
 0x34d   :  { %v803_v3 = vmul.f32 0.5, %v795_v63  ;;  %v785_v4 = vmul.f32 0.7978846, %v777_v0  ;;  %v2730_v63 = vpack.c.bf16 %v1153_v62, %v1152_v61  ;;  %v1154_v0 = vld [vmem:[%s3922_s9 + $0x60] sm:$0xff] }
 0x34e   :  { %v812_v5 = vmul.f32 %v804_v1, %v3310_v8  ;;  %2946 = vtanh.f32 %v786_v2  ;;  %v1155_v1 = vld [vmem:[%s3922_s9 + $0x68] sm:$0xff] }
 0x34f   :  { %v811_v6 = vmul.f32 %v803_v3, %v3312_v10  ;;  %2948 = vtanh.f32 %v785_v4  ;;  %v2733_v2 = vpack.c.bf16 %v1155_v1, %v1154_v0  ;;  %v1156_v3 = vld [vmem:[%s3922_s9 + $0x70] sm:$0xff]  ;;  %v1157_v4 = vld [vmem:[%s3922_s9 + $0x78] sm:$0xff] }
 0x350   :  { %v2939_v7 = vpop.eup %2938 }
 0x351   :  { %v2941_v9 = vpop.eup %2940  ;;  %v2666_v11 = vpack.c.bf16 %v812_v5, %v811_v6  ;;  %v798_v12 = vadd.f32 1.0, %v2939_v7  ;;  %v2736_v5 = vpack.c.bf16 %v1157_v4, %v1156_v3  ;;  %v1158_v6 = vld [vmem:[%s3922_s9 + $0x80] sm:$0xff]  ;;  %v1159_v7 = vld [vmem:[%s3922_s9 + $0x88] sm:$0xff] }
 0x352   :  { %v797_v13 = vadd.f32 1.0, %v2941_v9  ;;  %v2739_v9 = vpack.c.bf16 %v1159_v7, %v1158_v6 }
 0x353   :  { %v806_v14 = vmul.f32 0.5, %v798_v12  ;;  %2667 = vmatprep.subr.bf16.mxu0 %v2666_v11  ;;  %2683 = vmatprep.subr.bf16.mxu1 %v2666_v11  ;;  %v1161_v12 = vld [vmem:[%s3922_s9 + $0x98] sm:$0xff] }
 0x354   :  { %v2943_v15 = vpop.eup %2942  ;;  %v805_v16 = vmul.f32 0.5, %v797_v13  ;;  %2669 = vmatpush3.bf16.msra.mxu0 %v2666_v11  ;;  %2685 = vmatpush3.bf16.msra.mxu1 %v2666_v11 }
 0x355   :  { %v2945_v17 = vpop.eup %2944  ;;  %v814_v19 = vmul.f32 %v806_v14, %v3320_v18  ;;  %v800_v8 = vadd.f32 1.0, %v2943_v15  ;;  %v1162_v14 = vld [vmem:[%s3922_s9 + $0xa0] sm:$0xff]  ;;  %v1163_v15 = vld [vmem:[%s3922_s9 + $0xa8] sm:$0xff] }
 0x356   :  { %v813_v20 = vmul.f32 %v805_v16, %v3323_v21  ;;  %v799_v10 = vadd.f32 1.0, %v2945_v17  ;;  %v2745_v16 = vpack.c.bf16 %v1163_v15, %v1162_v14  ;;  %v1164_v17 = vld [vmem:[%s3922_s9 + $0xb0] sm:$0xff] }
 0x357   :  { %v808_v22 = vmul.f32 0.5, %v800_v8 }
 0x358   :  { %v2947_v23 = vpop.eup %2946  ;;  %v2670_v24 = vpack.c.bf16 %v814_v19, %v813_v20  ;;  %v807_v25 = vmul.f32 0.5, %v799_v10  ;;  %v1165_v19 = vld [vmem:[%s3922_s9 + $0xb8] sm:$0xff] }
 0x359   :  { %v2949_v26 = vpop.eup %2948  ;;  %v816_v27 = vmul.f32 %v808_v22, %v3331_v29  ;;  %v802_v28 = vadd.f32 1.0, %v2947_v23  ;;  %v2748_v8 = vpack.c.bf16 %v1165_v19, %v1164_v17 }
 0x35a   :  { %v815_v30 = vmul.f32 %v807_v25, %v3334_v32  ;;  %v801_v31 = vadd.f32 1.0, %v2949_v26  ;;  %2671 = vmatprep.subr.bf16.mxu0 %v2670_v24  ;;  %2687 = vmatprep.subr.bf16.mxu1 %v2670_v24  ;;  %v921_v32 = vld [vmem:[%s3920_s7 + $0x8] sm:$0xff]  ;;  %s3013_s7 = smov 64  }
 0x35b   :  { %v810_v33 = vmul.f32 0.5, %v802_v28  ;;  %2673 = vmatpush3.bf16.msra.mxu0 %v2670_v24  ;;  %2689 = vmatpush3.bf16.msra.mxu1 %v2670_v24 }
 0x35c   :  { %v2674_v18 = vpack.c.bf16 %v816_v27, %v815_v30  ;;  %v809_v34 = vmul.f32 0.5, %v801_v31 }
 0x35d   :  { %v818_v21 = vmul.f32 %v810_v33, %v3342_v40  ;;  %v822_v40 = vld [vmem:[%s3954_s1 + $0x18] sm:$0xff] }
 0x35e   :  { %v817_v35 = vmul.f32 %v809_v34, %v3346_v44  ;;  %2675 = vmatprep.subr.bf16.mxu0 %v2674_v18  ;;  %2691 = vmatprep.subr.bf16.mxu1 %v2674_v18  ;;  %v1024_v44 = vld [vmem:[%s3921_s8 + $0x18] sm:$0xff] }
 0x35f   :  { %2677 = vmatpush3.bf16.msra.mxu0 %v2674_v18  ;;  %2693 = vmatpush3.bf16.msra.mxu1 %v2674_v18 }
 0x360   :  { %v2678_v29 = vpack.c.bf16 %v818_v21, %v817_v35 }
 0x362   :  { %2679 = vmatprep.subr.bf16.mxu0 %v2678_v29  ;;  %2695 = vmatprep.subr.bf16.mxu1 %v2678_v29 }
 0x363   :  { %2681 = vmatpush3.bf16.msra.mxu0 %v2678_v29  ;;  %2697 = vmatpush3.bf16.msra.mxu1 %v2678_v29 }
 0x364   :  { %2699 = vmatprep.subr.bf16.mxu0 %v2666_v11  ;;  %2714 = vmatprep.subr.bf16.mxu1 %v3012_v48 }
 0x366   :  { %2557 = vmatmul.mubr.msk.f32.vlgmr.msra.gmra.mrb[16].mxu1 %vm256_vm1, %v921_v32  ;;  %2535 = vmatmul.mubr.msk.f32.vlgmr.msra.gmra.mrb[16].mxu0 %vm256_vm1, %v820_v36 }
 0x367   :  { %2701 = vmatpush3.bf16.msra.mxu0 %v2666_v11  ;;  %2559 = vmatprep.mubr.msk.f32.mxu1 %vm256_vm1, %v922_v37  ;;  %v1160_v11 = vld [vmem:[%s3922_s9 + $0x90] sm:$0xff] }
 0x368   :  { %2703 = vmatprep.subr.bf16.mxu0 %v2670_v24  ;;  %2537 = vmatprep.mubr.msk.f32.mxu0 %vm256_vm1, %v821_v38  ;;  %v2742_v13 = vpack.c.bf16 %v1161_v12, %v1160_v11  ;;  %v3015_v38 = vmov 0.0  }
 0x369   :  { %2716 = vmatpush1.bf16.msra.mxu1 %v2715_v49 }
 0x36a   :  { %2560 = vmatmul.mubr.msk.f32.gmra.mrb[18].mxu1 %vm256_vm1, %v923_v39  ;;  %2538 = vmatmul.mubr.msk.f32.gmra.mrb[18].mxu0 %vm256_vm1, %v822_v40  ;;  %v2293_v39 = vld [vmem:[%s3923_s10] ss:$0 sm:$0xff] }
 0x36b   :  { %2705 = vmatpush3.bf16.msra.mxu0 %v2670_v24  ;;  %2578 = vmatprep.mubr.msk.f32.mxu0 %vm256_vm1, %v1021_v41 }
 0x36c   :  { %2707 = vmatprep.subr.bf16.mxu0 %v2674_v18  ;;  %2717 = vmatprep.subr.bf16.mxu1 %v3012_v48 }
 0x36d   :  { %2719 = vmatpush1.bf16.msra.mxu1 %v2718_v51 }
 0x36e   :  { %2720 = vmatprep.subr.bf16.mxu1 %v3012_v48 }
 0x36f   :  { %2709 = vmatpush3.bf16.msra.mxu0 %v2674_v18 }
 0x370   :  { %2711 = vmatprep.subr.bf16.mxu0 %v2678_v29 }
 0x371   :  { %2722 = vmatpush1.bf16.msra.mxu1 %v2721_v54 }
 0x372   :  { %2723 = vmatprep.subr.bf16.mxu1 %v3012_v48 }
 0x373   :  { %2713 = vmatpush3.bf16.msra.mxu0 %v2678_v29 }
 0x374   :  { %2750 = vmatprep.subr.bf16.mxu0 %v3012_v48 }
 0x375   :  { %2725 = vmatpush1.bf16.msra.mxu1 %v2724_v57 }
 0x376   :  { %2579 = vmatmul.mubr.msk.f32.vlgmr.msra.gmra.mrb[20].mxu0 %vm256_vm1, %v1022_v42  ;;  %2726 = vmatprep.subr.bf16.mxu1 %v3012_v48 }
 0x377   :  { %2581 = vmatprep.mubr.msk.f32.mxu0 %vm256_vm1, %v1023_v43 }
 0x379   :  { %2728 = vmatpush1.bf16.msra.mxu1 %v2727_v60 }
 0x37a   :  { %2582 = vmatmul.mubr.msk.f32.gmra.mrb[22].mxu0 %vm256_vm1, %v1024_v44  ;;  %2729 = vmatprep.subr.bf16.mxu1 %v3012_v48 }
 0x37b   :  { %2592 = vmatprep.mubr.msk.f32.mxu0 %vm3014_vm4, %v3015_v38 }
 0x37d   :  { %2731 = vmatpush1.bf16.msra.mxu1 %v2730_v63 }
 0x37e   :  { %2732 = vmatprep.subr.bf16.mxu1 %v3012_v48 }
 0x381   :  { %2734 = vmatpush1.bf16.msra.mxu1 %v2733_v2 }
 0x382   :  { %2735 = vmatprep.subr.bf16.mxu1 %v3012_v48 }
 0x385   :  { %2737 = vmatpush1.bf16.msra.mxu1 %v2736_v5 }
 0x386   :  { %2738 = vmatprep.subr.bf16.mxu1 %v3012_v48 }
 0x389   :  { %2740 = vmatpush1.bf16.msra.mxu1 %v2739_v9 }
 0x38a   :  { %2741 = vmatprep.subr.bf16.mxu1 %v3012_v48 }
 0x38d   :  { %2743 = vmatpush1.bf16.msra.mxu1 %v2742_v13 }
 0x38e   :  { %2744 = vmatprep.subr.bf16.mxu1 %v3012_v48 }
 0x391   :  { %2746 = vmatpush1.bf16.msra.mxu1 %v2745_v16 }
 0x392   :  { %2747 = vmatprep.subr.bf16.mxu1 %v3012_v48 }
 0x395   :  { %2749 = vmatpush1.bf16.msra.mxu1 %v2748_v8 }
 0x396   :  { %2816 = vmatprep.subr.bf16.mxu1 %v3012_v48 }
 0x439   :  { %v2558_v20 = vpop.f32.mrb[16].mxu1  ;;  %v2536_v10 = vpop.f32.mrb[16].mxu0 }
 0x43a   :  { %1128 = vrot.lane.b32.xlu1 %v2558_v20, %s3013_s7  ;;  %v1002_v22 = vpop.f32.mrb[17].mxu1  ;;  %v901_v23 = vpop.f32.mrb[17].mxu0 }
 0x43b   :  { %1126 = vrot.lane.b32.xlu0 %v1002_v22, %s3013_s7 }
 0x43d   :  { %v2561_v24 = vpop.f32.mrb[18].mxu1  ;;  %v2539_v25 = vpop.f32.mrb[18].mxu0 }
 0x43e   :  { %1132 = vrot.lane.b32.xlu1 %v2561_v24, %s3013_s7  ;;  %v1012_v26 = vpop.f32.mrb[19].mxu1  ;;  %v911_v27 = vpop.f32.mrb[19].mxu0 }
 0x43f   :  { %1130 = vrot.lane.b32.xlu0 %v1012_v26, %s3013_s7 }
 0x449   :  { %v2580_v28 = vpop.f32.mrb[20].mxu0 }
 0x44a   :  { %v1103_v30 = vpop.f32.mrb[21].mxu0 }
 0x44b   :  { %2294 = vmatprep.mubr.msk.f32.mxu1 %vm256_vm1, %v1103_v30  ;;  %v1381_v30 = vld [vmem:[%s3925_s12 + $0x8] sm:$0xff] }
 0x44d   :  { %v2583_v31 = vpop.f32.mrb[22].mxu0 }
 0x44e   :  { %v1113_v33 = vpop.f32.mrb[23].mxu0 }
 0x4ac   :  { %v1129_v21 = vpop.permute.xlu1 %1128 }
 0x4ad   :  { %v1127_v18 = vpop.permute.xlu0 %1126  ;;  %v1139_v35 = vsel %vm256_vm1, %v2536_v10, %v1129_v21  ;;  %v1383_v21 = vld [vmem:[%s3925_s12 + $0x18] sm:$0xff] }
 0x4ae   :  { %v1138_v34 = vsel %vm256_vm1, %v901_v23, %v1127_v18 }
 0x4af   :  { %1250 = vmatmul.mubr.f32.vlgmr.msra.gmra.mrb[20].mxu1 %v1138_v34  ;;  %v1382_v34 = vld [vmem:[%s3925_s12 + $0x10] sm:$0xff] }
 0x4b0   :  { %2295 = vmatprep.mubr.msk.f32.mxu1 %vm256_vm1, %v2580_v28  ;;  %v1133_v36 = vpop.permute.xlu1 %1132  ;;  %v1380_v28 = vld [vmem:[%s3925_s12] sm:$0xff] }
 0x4b1   :  { %v1131_v29 = vpop.permute.xlu0 %1130  ;;  %v1141_v37 = vsel %vm256_vm1, %v2539_v25, %v1133_v36  ;;  %v2757_v18 = vpack.c.bf16 %v1381_v30, %v1380_v28  ;;  %v1572_v28 = vld [vmem:[%s3929_s16 + $0xa8] sm:$0xff]  ;;  %v1574_v30 = vld [vmem:[%s3929_s16 + $0xb8] sm:$0xff] }
 0x4b2   :  { %v1140_v32 = vsel %vm256_vm1, %v911_v27, %v1131_v29  ;;  %v1384_v29 = vld [vmem:[%s3925_s12 + $0x20] sm:$0xff] }
 0x4b3   :  { %1255 = vmatmul.mubr.f32.gmra.mrb[22].mxu1 %v1139_v35  ;;  %v2760_v35 = vpack.c.bf16 %v1383_v21, %v1382_v34  ;;  %v1573_v34 = vld [vmem:[%s3929_s16 + $0xb0] sm:$0xff]  ;;  %v1576_v21 = vld [vmem:[%s3929_s16 + $0xc8] sm:$0xff] }
 0x4b4   :  { %2296 = vmatprep.mubr.msk.f32.mxu1 %vm256_vm1, %v1113_v33  ;;  %v1306_v33 = vld [vmem:[%s3924_s11] sm:$0xf] }
 0x4b7   :  { %1260 = vmatmul.mubr.f32.gmra.mrb[24].mxu1 %v1140_v32  ;;  %v1385_v32 = vld [vmem:[%s3925_s12 + $0x28] sm:$0xff] }
 0x4b8   :  { %2297 = vmatprep.mubr.msk.f32.mxu1 %vm256_vm1, %v2583_v31  ;;  %v2763_v36 = vpack.c.bf16 %v1385_v32, %v1384_v29 }
 0x4bb   :  { %1265 = vmatmul.mubr.f32.gmra.mrb[26].mxu1 %v1141_v37  ;;  %v1386_v37 = vld [vmem:[%s3925_s12 + $0x30] sm:$0xff] }
 0x582   :  { %v1251_v40 = vpop.f32.mrb[20].mxu1 }
 0x583   :  { %v1252_v41 = vadd.f32 %v2293_v39, %v1251_v40  ;;  %v1253_v42 = vpop.f32.mrb[21].mxu1 }
 0x584   :  { %v1471_v42 = vld [vmem:[%s3927_s14 + $0x18] sm:$0xff] }
 0x585   :  { %v1270_v43 = vmul.f32 %v1252_v41, %v1252_v41 }
 0x586   :  { %v1256_v44 = vpop.f32.mrb[22].mxu1 }
 0x587   :  { %v1274_v45 = vmul.f32 %v1270_v43, %v1252_v41  ;;  %v1257_v46 = vadd.f32 %v2293_v39, %v1256_v44  ;;  %v1258_v47 = vpop.f32.mrb[23].mxu1  ;;  %v1468_v44 = vld [vmem:[%s3927_s14] sm:$0xff] }
 0x588   :  { %v1475_v47 = vld [vmem:[%s3927_s14 + $0x38] sm:$0xff] }
 0x589   :  { %v1278_v49 = vmul.f32 0.044715, %v1274_v45  ;;  %v1271_v50 = vmul.f32 %v1257_v46, %v1257_v46  ;;  %v1470_v45 = vld [vmem:[%s3927_s14 + $0x10] sm:$0xff] }
 0x58a   :  { %v1261_v51 = vpop.f32.mrb[24].mxu1 }
 0x58b   :  { %v1282_v52 = vadd.f32 %v1278_v49, %v1252_v41  ;;  %v1275_v53 = vmul.f32 %v1271_v50, %v1257_v46  ;;  %v1262_v54 = vadd.f32 %v2293_v39, %v1261_v51  ;;  %v1263_v55 = vpop.f32.mrb[25].mxu1  ;;  %v2770_v49 = vpack.c.bf16 %v1470_v45, %v1468_v44  ;;  %v1472_v51 = vld [vmem:[%s3927_s14 + $0x20] sm:$0xff]  ;;  %v1581_v44 = vld [vmem:[%s3929_s16 + $0xf0] sm:$0xff]  ;;  %v1584_v45 = vld [vmem:[%s3929_s16 + $0x108] sm:$0xff] }
 0x58d   :  { %v1286_v56 = vmul.f32 0.7978846, %v1282_v52  ;;  %v1279_v57 = vmul.f32 0.044715, %v1275_v53  ;;  %v1272_v58 = vmul.f32 %v1262_v54, %v1262_v54  ;;  %v1474_v52 = vld [vmem:[%s3927_s14 + $0x30] sm:$0xff] }
 0x58e   :  { %v1266_v59 = vpop.f32.mrb[26].mxu1  ;;  %v2774_v55 = vpack.c.bf16 %v1474_v52, %v1472_v51  ;;  %v1585_v51 = vld [vmem:[%s3929_s16 + $0x110] sm:$0xff]  ;;  %v1588_v52 = vld [vmem:[%s3929_s16 + $0x128] sm:$0xff] }
 0x58f   :  { %2950 = vtanh.f32 %v1286_v56  ;;  %v1283_v60 = vadd.f32 %v1279_v57, %v1257_v46  ;;  %v1276_v61 = vmul.f32 %v1272_v58, %v1262_v54  ;;  %v1267_v62 = vadd.f32 %v2293_v39, %v1266_v59  ;;  %v1268_v63 = vpop.f32.mrb[27].mxu1  ;;  %v1387_v39 = vld [vmem:[%s3925_s12 + $0x38] sm:$0xff]  ;;  %v1552_v56 = vld [vmem:[%s3929_s16 + $0x8] sm:$0xff]  ;;  %v1551_v59 = vld [vmem:[%s3929_s16] sm:$0xff] }
 0x590   :  { %v2766_v40 = vpack.c.bf16 %v1387_v39, %v1386_v37  ;;  %v1554_v57 = vld [vmem:[%s3929_s16 + $0x18] sm:$0xff]  ;;  %v1577_v37 = vld [vmem:[%s3929_s16 + $0xd0] sm:$0xff]  ;;  %v1580_v39 = vld [vmem:[%s3929_s16 + $0xe8] sm:$0xff] }
 0x591   :  { %v1287_v0 = vmul.f32 0.7978846, %v1283_v60  ;;  %v1280_v1 = vmul.f32 0.044715, %v1276_v61  ;;  %v1273_v2 = vmul.f32 %v1267_v62, %v1267_v62  ;;  %v2776_v58 = vpack.c.bf16 %v1554_v57, %v1552_v56  ;;  %v3581_v60 = vld [vmem:[%s3928_s15] sm:$0x77] }
 0x592   :  { %v2299_v61 = vld [vmem:[%s3926_s13] ss:$0 sm:$0xff]  ;;  %v1558_v63 = vld [vmem:[%s3929_s16 + $0x38] sm:$0xff]  ;;  %v1589_v57 = vld [vmem:[%s3929_s16 + $0x130] sm:$0xff] }
 0x593   :  { %2952 = vtanh.f32 %v1287_v0  ;;  %v1284_v3 = vadd.f32 %v1280_v1, %v1262_v54  ;;  %v1277_v4 = vmul.f32 %v1273_v2, %v1267_v62  ;;  %v1592_v2 = vcombine.high %v3581_v60, %v3581_v60  ;;  %v1587_v56 = vld [vmem:[%s3929_s16 + $0x120] sm:$0xff] }
 0x595   :  { %v1288_v5 = vmul.f32 0.7978846, %v1284_v3  ;;  %v1281_v6 = vmul.f32 0.044715, %v1277_v4 }
 0x597   :  { %2954 = vtanh.f32 %v1288_v5  ;;  %v1285_v7 = vadd.f32 %v1281_v6, %v1267_v62  ;;  %v1555_v6 = vld [vmem:[%s3929_s16 + $0x20] sm:$0xff] }
 0x599   :  { %v2951_v9 = vpop.eup %2950  ;;  %v1289_v11 = vmul.f32 0.7978846, %v1285_v7  ;;  %v1557_v7 = vld [vmem:[%s3929_s16 + $0x30] sm:$0xff] }
 0x59a   :  { %v1294_v12 = vadd.f32 1.0, %v2951_v9  ;;  %v1560_v9 = vld [vmem:[%s3929_s16 + $0x48] sm:$0xff] }
 0x59b   :  { %2956 = vtanh.f32 %v1289_v11  ;;  %v1562_v11 = vld [vmem:[%s3929_s16 + $0x58] sm:$0xff] }
 0x59c   :  { %v1298_v14 = vmul.f32 0.5, %v1294_v12  ;;  %v2782_v12 = vpack.c.bf16 %v1557_v7, %v1555_v6  ;;  %v1675_v7 = vld [vmem:[%s3931_s18 + $0x40] sm:$0xff] }
 0x59d   :  { %v2953_v13 = vpop.eup %2952 }
 0x59e   :  { %v1295_v15 = vadd.f32 1.0, %v2953_v13  ;;  %v1302_v19 = vmul.f32 %v1298_v14, %v1252_v41  ;;  %v1469_v41 = vld [vmem:[%s3927_s14 + $0x8] sm:$0xff]  ;;  %v2784_v13 = vpack.c.bf16 %v1562_v11, %v1560_v9  ;;  %v1559_v14 = vld [vmem:[%s3929_s16 + $0x40] sm:$0xff] }
 0x59f   :  { %v2768_v43 = vpack.c.bf16 %v1471_v42, %v1469_v41  ;;  %v1676_v9 = vld [vmem:[%s3931_s18 + $0x48] sm:$0xff] }
 0x5a0   :  { %v1299_v16 = vmul.f32 0.5, %v1295_v15  ;;  %v1561_v15 = vld [vmem:[%s3929_s16 + $0x50] sm:$0xff]  ;;  %v3755_v11 = vpack.c.bf16 %v1676_v9, %v1675_v7 }
 0x5a1   :  { %v2955_v17 = vpop.eup %2954 }
 0x5a2   :  { %v1303_v8 = vmul.f32 %v1299_v16, %v1257_v46  ;;  %v1296_v20 = vadd.f32 1.0, %v2955_v17  ;;  %v1473_v46 = vld [vmem:[%s3927_s14 + $0x28] sm:$0xff]  ;;  %v1566_v17 = vld [vmem:[%s3929_s16 + $0x78] sm:$0xff] }
 0x5a3   :  { %v2772_v50 = vpack.c.bf16 %v1475_v47, %v1473_v46  ;;  %v1564_v16 = vld [vmem:[%s3929_s16 + $0x68] sm:$0xff]  ;;  %v1586_v46 = vld [vmem:[%s3929_s16 + $0x118] sm:$0xff] }
 0x5a4   :  { %v2751_v10 = vpack.c.bf16 %v1303_v8, %v1302_v19  ;;  %v1300_v23 = vmul.f32 0.5, %v1296_v20  ;;  %v2786_v19 = vpack.c.bf16 %v1561_v15, %v1559_v14  ;;  %v2788_v8 = vpack.c.bf16 %v1566_v17, %v1564_v16  ;;  %v1563_v20 = vld [vmem:[%s3929_s16 + $0x60] sm:$0xff]  ;;  %v1680_v16 = vld [vmem:[%s3931_s18 + $0x68] sm:$0xff] }
 0x5a5   :  { %v2957_v22 = vpop.eup %2956  ;;  %v1679_v15 = vld [vmem:[%s3931_s18 + $0x60] sm:$0xff] }
 0x5a6   :  { %v1297_v24 = vadd.f32 1.0, %v2957_v22  ;;  %2752 = vmatpush3.bf16.msra.mxu0 %v2751_v10  ;;  %v1304_v26 = vmul.f32 %v1300_v23, %v1262_v54  ;;  %v1565_v10 = vld [vmem:[%s3929_s16 + $0x70] sm:$0xff]  ;;  %v1568_v22 = vld [vmem:[%s3929_s16 + $0x88] sm:$0xff]  ;;  %v1570_v23 = vld [vmem:[%s3929_s16 + $0x98] sm:$0xff]  ;;  %v3781_v17 = vpack.c.bf16 %v1680_v16, %v1679_v15 }
 0x5a7   :  { %2753 = vmatprep.subr.bf16.mxu0 %v3012_v48 }
 0x5a8   :  { %v1301_v25 = vmul.f32 0.5, %v1297_v24  ;;  %v2790_v24 = vpack.c.bf16 %v1565_v10, %v1563_v20  ;;  %v1683_v10 = vld [vmem:[%s3931_s18 + $0x80] sm:$0xff] }
 0x5aa   :  { %v1305_v27 = vmul.f32 %v1301_v25, %v1267_v62  ;;  %v1556_v62 = vld [vmem:[%s3929_s16 + $0x28] sm:$0xff]  ;;  %v2792_v25 = vpack.c.bf16 %v1570_v23, %v1568_v22 }
 0x5ab   :  { %v2780_v5 = vpack.c.bf16 %v1558_v63, %v1556_v62  ;;  %v1670_v63 = vld [vmem:[%s3931_s18 + $0x18] sm:$0xff]  ;;  %v1684_v22 = vld [vmem:[%s3931_s18 + $0x88] sm:$0xff] }
 0x5ac   :  { %v2754_v31 = vpack.c.bf16 %v1305_v27, %v1304_v26  ;;  %v1567_v26 = vld [vmem:[%s3929_s16 + $0x80] sm:$0xff]  ;;  %v1569_v27 = vld [vmem:[%s3929_s16 + $0x90] sm:$0xff]  ;;  %v3804_v23 = vpack.c.bf16 %v1684_v22, %v1683_v10 }
 0x5ae   :  { %2755 = vmatpush3.bf16.msra.mxu0 %v2754_v31  ;;  %v2794_v31 = vpack.c.bf16 %v1569_v27, %v1567_v26 }
 0x5af   :  { %2756 = vmatprep.subr.bf16.mxu0 %v3012_v48 }
 0x5b1   :  { %2593 = vmatmul.mubr.msk.f32.vlgmr.msra.gmra.mrb[24].mxu0 %vm86_vm0, %v1306_v33  ;;  %v2796_v33 = vpack.c.bf16 %v1574_v30, %v1572_v28  ;;  %v1688_v30 = vlaneseq }
 0x5b2   :  { %2758 = vmatpush3.bf16.msra.mxu0 %v2757_v18  ;;  %2611 = vmatprep.mubr.msk.f32.mxu0 %vm3014_vm4, %v3015_v38  ;;  %v1571_v18 = vld [vmem:[%s3929_s16 + $0xa0] sm:$0xff] }
 0x5b3   :  { %2759 = vmatprep.subr.bf16.mxu0 %v3012_v48  ;;  %v2798_v29 = vpack.c.bf16 %v1573_v34, %v1571_v18  ;;  %v1666_v34 = vld [vmem:[%s3930_s17] sm:$0x3] }
 0x5b6   :  { %2761 = vmatpush3.bf16.msra.mxu0 %v2760_v35  ;;  %v1578_v35 = vld [vmem:[%s3929_s16 + $0xd8] sm:$0xff] }
 0x5b7   :  { %2762 = vmatprep.subr.bf16.mxu0 %v3012_v48  ;;  %v2800_v32 = vpack.c.bf16 %v1578_v35, %v1576_v21 }
 0x5ba   :  { %2764 = vmatpush3.bf16.msra.mxu0 %v2763_v36  ;;  %v1575_v36 = vld [vmem:[%s3929_s16 + $0xc0] sm:$0xff] }
 0x5bb   :  { %2765 = vmatprep.subr.bf16.mxu0 %v3012_v48  ;;  %v2802_v41 = vpack.c.bf16 %v1577_v37, %v1575_v36 }
 0x5be   :  { %2767 = vmatpush3.bf16.msra.mxu0 %v2766_v40  ;;  %v1582_v40 = vld [vmem:[%s3929_s16 + $0xf8] sm:$0xff] }
 0x5bf   :  { %2769 = vmatprep.subr.bf16.mxu0 %v2768_v43  ;;  %v2804_v42 = vpack.c.bf16 %v1582_v40, %v1580_v39  ;;  %v1579_v43 = vld [vmem:[%s3929_s16 + $0xe0] sm:$0xff] }
 0x5c0   :  { %v2806_v47 = vpack.c.bf16 %v1581_v44, %v1579_v43 }
 0x684   :  { %v1376_v53 = vpop.f32.mrb[24].mxu0 }
 0x685   :  { %v2594_v54 = vpop.f32.mrb[25].mxu0  ;;  %2612 = vmatmul.mubr.msk.f32.vlgmr.msra.gmra.mrb[26].mxu0 %vm256_vm1, %v1376_v53  ;;  %v1590_v53 = vld [vmem:[%s3929_s16 + $0x138] sm:$0xff]  ;;  %vm2232_vm1 = vcmask 35840  }
 0x686   :  { %2771 = vmatpush1.bf16.msra.mxu0 %v2770_v49  ;;  %1543 = vmatprep.mubr.f32.mxu0 %v3015_v38  ;;  %v1553_v38 = vld [vmem:[%s3929_s16 + $0x10] sm:$0xff]  ;;  %v2808_v49 = vpack.c.bf16 %v1586_v46, %v1584_v45 }
 0x687   :  { %2773 = vmatprep.subr.bf16.mxu0 %v2772_v50  ;;  %v2778_v1 = vpack.c.bf16 %v1553_v38, %v1551_v59  ;;  %v1583_v50 = vld [vmem:[%s3929_s16 + $0x100] sm:$0xff]  ;;  %v1668_v38 = vld [vmem:[%s3931_s18 + $0x8] sm:$0xff] }
 0x688   :  { %v2810_v54 = vpack.c.bf16 %v1585_v51, %v1583_v50  ;;  %v1667_v59 = vld [vmem:[%s3931_s18] sm:$0xff] }
 0x689   :  { %v3712_v62 = vpack.c.bf16 %v1668_v38, %v1667_v59 }
 0x68a   :  { %2775 = vmatpush1.bf16.msra.mxu0 %v2774_v55  ;;  %v2812_v55 = vpack.c.bf16 %v1590_v53, %v1588_v52 }
 0x68b   :  { %2777 = vmatprep.subr.bf16.mxu0 %v2776_v58  ;;  %v2814_v58 = vpack.c.bf16 %v1589_v57, %v1587_v56  ;;  %2818 = vmatpush1.bf16.msra.mxu1 %v3712_v62 }
 0x68c   :  { %2819 = vmatprep.subr.bf16.mxu1 %v3012_v48 }
 0x758   :  { %v1464_v0 = vpop.f32.mrb[26].mxu0 }
 0x759   :  { %v3594_v3 = vadd.f32 %v2299_v61, %v1464_v0  ;;  %v2613_v4 = vpop.f32.mrb[27].mxu0  ;;  %v1669_v61 = vld [vmem:[%s3931_s18 + $0x10] sm:$0xff]  ;;  %v1671_v0 = vld [vmem:[%s3931_s18 + $0x20] sm:$0xff] }
 0x75a   :  { %v1673_v4 = vld [vmem:[%s3931_s18 + $0x30] sm:$0xff] }
 0x75b   :  { %2301 = vmatmul.mubr.msk.f32.vlgmr.msra.gmra.mrb[28].mxu0 %vm86_vm0, %v3594_v3 }
 0x75c   :  { %2779 = vmatpush1.bf16.msra.mxu0 %v2778_v1  ;;  %2302 = vmatprep.mubr.msk.f32.mxu0 %vm86_vm0, %v1592_v2  ;;  %v1672_v1 = vld [vmem:[%s3931_s18 + $0x28] sm:$0xff] }
 0x75d   :  { %2781 = vmatprep.subr.bf16.mxu0 %v2780_v5  ;;  %v3731_v2 = vpack.c.bf16 %v1672_v1, %v1671_v0  ;;  %v1674_v5 = vld [vmem:[%s3931_s18 + $0x38] sm:$0xff] }
 0x75e   :  { %v3743_v6 = vpack.c.bf16 %v1674_v5, %v1673_v4 }
 0x760   :  { %2783 = vmatpush1.bf16.msra.mxu0 %v2782_v12  ;;  %v1677_v12 = vld [vmem:[%s3931_s18 + $0x50] sm:$0xff] }
 0x761   :  { %2785 = vmatprep.subr.bf16.mxu0 %v2784_v13  ;;  %v1678_v13 = vld [vmem:[%s3931_s18 + $0x58] sm:$0xff] }
 0x762   :  { %v3769_v14 = vpack.c.bf16 %v1678_v13, %v1677_v12 }
 0x764   :  { %2787 = vmatpush1.bf16.msra.mxu0 %v2786_v19  ;;  %v1681_v19 = vld [vmem:[%s3931_s18 + $0x70] sm:$0xff] }
 0x765   :  { %2789 = vmatprep.subr.bf16.mxu0 %v2788_v8  ;;  %v1682_v8 = vld [vmem:[%s3931_s18 + $0x78] sm:$0xff] }
 0x766   :  { %v3793_v20 = vpack.c.bf16 %v1682_v8, %v1681_v19 }
 0x768   :  { %2791 = vmatpush1.bf16.msra.mxu0 %v2790_v24  ;;  %v1685_v24 = vld [vmem:[%s3931_s18 + $0x90] sm:$0xff] }
 0x769   :  { %2793 = vmatprep.subr.bf16.mxu0 %v2792_v25  ;;  %v1686_v25 = vld [vmem:[%s3931_s18 + $0x98] sm:$0xff] }
 0x76a   :  { %v3815_v26 = vpack.c.bf16 %v1686_v25, %v1685_v24 }
 0x76c   :  { %2795 = vmatpush1.bf16.msra.mxu0 %v2794_v31  ;;  %v3823_v31 = vshrl.u32 %v1688_v30, 7 }
 0x76d   :  { %2797 = vmatprep.subr.bf16.mxu0 %v2796_v33 }
 0x76e   :  { %v3826_v33 = vsub.s32 1, %v3823_v31  ;;  %v3829_v18 = vsub.s32 2, %v3823_v31  ;;  %v3835_v21 = vsub.s32 0, %v3823_v31 }
 0x770   :  { %2799 = vmatpush1.bf16.msra.mxu0 %v2798_v29 }
 0x771   :  { %2801 = vmatprep.subr.bf16.mxu0 %v2800_v32  ;;  %v1702_v32 = vrot.slane %v1666_v34, %v3835_v21 }
 0x774   :  { %2803 = vmatpush1.bf16.msra.mxu0 %v2802_v41  ;;  %v1706_v41 = vrot.slane %v1666_v34, %v3826_v33 }
 0x775   :  { %2805 = vmatprep.subr.bf16.mxu0 %v2804_v42 }
 0x778   :  { %2807 = vmatpush1.bf16.msra.mxu0 %v2806_v47 }
 0x779   :  { %2809 = vmatprep.subr.bf16.mxu0 %v2808_v49 }
 0x77c   :  { %2811 = vmatpush1.bf16.msra.mxu0 %v2810_v54 }
 0x77d   :  { %2813 = vmatprep.subr.bf16.mxu0 %v2812_v55 }
 0x780   :  { %2815 = vmatpush1.bf16.msra.mxu0 %v2814_v58 }
 0x781   :  { %2846 = vmatprep.subr.bf16.mxu0 %v3012_v48 }
 0x783   :  { %1660 = vmatmul.mubr.f32.vlgmr.msra.gmra.mrb[30].mxu0 %v3581_v60  ;;  %v3719_v60 = vpack.c.bf16 %v1670_v63, %v1669_v61  ;;  %v2303_v63 = vld [vmem:[%s3932_s19] ss:$0 sm:$0xff] }
 0x784   :  { %2848 = vmatpush1.bf16.msra.mxu0 %v3712_v62 }
 0x785   :  { %2849 = vmatprep.subr.bf16.mxu0 %v3012_v48  ;;  %2821 = vmatpush1.bf16.msra.mxu1 %v3719_v60 }
 0x786   :  { %2822 = vmatprep.subr.bf16.mxu1 %v3012_v48 }
 0x788   :  { %2851 = vmatpush1.bf16.msra.mxu0 %v3719_v60 }
 0x789   :  { %2852 = vmatprep.subr.bf16.mxu0 %v3012_v48  ;;  %2824 = vmatpush1.bf16.msra.mxu1 %v3731_v2 }
 0x78a   :  { %2825 = vmatprep.subr.bf16.mxu1 %v3012_v48 }
 0x78c   :  { %2854 = vmatpush1.bf16.msra.mxu0 %v3731_v2 }
 0x78d   :  { %2855 = vmatprep.subr.bf16.mxu0 %v3012_v48  ;;  %2827 = vmatpush1.bf16.msra.mxu1 %v3743_v6 }
 0x78e   :  { %2828 = vmatprep.subr.bf16.mxu1 %v3012_v48 }
 0x790   :  { %2857 = vmatpush1.bf16.msra.mxu0 %v3743_v6 }
 0x791   :  { %2858 = vmatprep.subr.bf16.mxu0 %v3012_v48  ;;  %2830 = vmatpush1.bf16.msra.mxu1 %v3755_v11 }
 0x792   :  { %2831 = vmatprep.subr.bf16.mxu1 %v3012_v48 }
 0x794   :  { %2860 = vmatpush1.bf16.msra.mxu0 %v3755_v11 }
 0x795   :  { %2861 = vmatprep.subr.bf16.mxu0 %v3012_v48  ;;  %2833 = vmatpush1.bf16.msra.mxu1 %v3769_v14 }
 0x796   :  { %2834 = vmatprep.subr.bf16.mxu1 %v3012_v48 }
 0x798   :  { %2863 = vmatpush1.bf16.msra.mxu0 %v3769_v14 }
 0x799   :  { %2864 = vmatprep.subr.bf16.mxu0 %v3012_v48  ;;  %2836 = vmatpush1.bf16.msra.mxu1 %v3781_v17 }
 0x79a   :  { %2837 = vmatprep.subr.bf16.mxu1 %v3012_v48 }
 0x79c   :  { %2866 = vmatpush1.bf16.msra.mxu0 %v3781_v17 }
 0x79d   :  { %2867 = vmatprep.subr.bf16.mxu0 %v3012_v48  ;;  %2839 = vmatpush1.bf16.msra.mxu1 %v3793_v20 }
 0x79e   :  { %2840 = vmatprep.subr.bf16.mxu1 %v3012_v48 }
 0x7a0   :  { %2869 = vmatpush1.bf16.msra.mxu0 %v3793_v20 }
 0x7a1   :  { %2870 = vmatprep.subr.bf16.mxu0 %v3012_v48  ;;  %2842 = vmatpush1.bf16.msra.mxu1 %v3804_v23 }
 0x7a2   :  { %2843 = vmatprep.subr.bf16.mxu1 %v3012_v48 }
 0x7a4   :  { %2872 = vmatpush1.bf16.msra.mxu0 %v3804_v23 }
 0x7a5   :  { %2873 = vmatprep.subr.bf16.mxu0 %v3012_v48  ;;  %2845 = vmatpush1.bf16.msra.mxu1 %v3815_v26 }
 0x7a6   :  { %2876 = vmatprep.subr.bf16.mxu1 %v3012_v48 }
 0x7a8   :  { %2875 = vmatpush1.bf16.msra.mxu0 %v3815_v26 }
 0x82e   :  { %v1545_v27 = vpop.f32.mrb[28].mxu0 }
 0x82f   :  { %v1547_v28 = vpop.f32.mrb[29].mxu0 }
 0x856   :  { %v1661_v35 = vpop.f32.mrb[30].mxu0 }
 0x857   :  { %v1691_v29 = vrot.slane %v1661_v35, %v3835_v21  ;;  %v1795_v36 = vrot.slane %v1661_v35, %v3826_v33  ;;  %v1882_v37 = vrot.slane %v1661_v35, %v3829_v18  ;;  %v1663_v39 = vpop.f32.mrb[31].mxu0 }
 0x858   :  { %v1695_v40 = vrot.slane %v1663_v39, %v3835_v21  ;;  %v1799_v42 = vrot.slane %v1663_v39, %v3826_v33  ;;  %v1886_v43 = vrot.slane %v1663_v39, %v3829_v18 }
 0x859   :  { %v1696_v44 = vadd.f32 %v1691_v29, %v1545_v27  ;;  %v1800_v45 = vadd.f32 %v1795_v36, %v1545_v27  ;;  %v1887_v46 = vadd.f32 %v1882_v37, %v1545_v27  ;;  %v2004_v36 = vsub.s32 3, %v3823_v31 }
 0x85a   :  { %v1697_v47 = vadd.f32 %v1695_v40, %v1547_v28  ;;  %v1801_v49 = vadd.f32 %v1799_v42, %v1547_v28  ;;  %v1888_v50 = vadd.f32 %v1886_v43, %v1547_v28 }
 0x85b   :  { %v1709_v51 = vadd.f32 %v1702_v32, %v1696_v44  ;;  %v1802_v54 = vadd.f32 %v1800_v45, %v1702_v32  ;;  %v1889_v61 = vadd.f32 %v1887_v46, %v1702_v32  ;;  %v3016_v44 = vmov 0  }
 0x85c   :  { %v1710_v52 = vadd.f32 %v1706_v41, %v1697_v47  ;;  %v1803_v53 = vadd.f32 %v1801_v49, %v1706_v41  ;;  %v1890_v55 = vadd.f32 %v1888_v50, %v1706_v41  ;;  %2915 = vset.pattern.permute.xlu1 %v3016_v44  ;;  %2916 = vset.pattern.permute.xlu0 %v3016_v44  ;;  %v3017_v45 = vmov 1966171168  }
 0x85d   :  { %2958 = vtanh.f32 %v1709_v51  ;;  %v2093_v46 = vunpack.c.l.s4 %v3017_v45 }
 0x85e   :  { %2960 = vtanh.f32 %v1710_v52 }
 0x85f   :  { %2962 = vtanh.f32 %v1803_v53  ;;  %v2094_v47 = vunpack.c.0.s8 %v2093_v46 }
 0x860   :  { %2964 = vtanh.f32 %v1802_v54 }
 0x861   :  { %2966 = vtanh.f32 %v1890_v55  ;;  %v2097_v51 = vsub.s32 %v2094_v47, %v3823_v31 }
 0x862   :  { %2968 = vtanh.f32 %v1889_v61 }
 0x863   :  { %v2098_v53 = vrot.slane %v3594_v3, %v2097_v51  ;;  %v2308_v3 = vld [vmem:[%s3933_s20 + $0x10] sm:$0x1f] }
 0x867   :  { %v2959_v56 = vpop.eup %2958 }
 0x868   :  { %v2961_v57 = vpop.eup %2960 }
 0x869   :  { %v2963_v58 = vpop.eup %2962  ;;  %2304 = vmatprep.mubr.msk.f32.mxu1 %vm86_vm0, %v2961_v57  ;;  %v2009_v57 = vld [vmem:[%s3933_s20] sm:$0x1f] }
 0x86a   :  { %v2965_v59 = vpop.eup %2964  ;;  %2305 = vmatprep.mubr.msk.f32.mxu0 %vm86_vm0, %v2963_v58  ;;  %1787 = vmatmul.mubr.f32.vlgmr.msra.gmra.mrb[28].mxu1 %v2959_v56  ;;  %v2099_v56 = vcombine.high %v2098_v53, %v2098_v53 }
 0x86b   :  { %v2967_v38 = vpop.eup %2966  ;;  %1874 = vmatmul.mubr.f32.vlgmr.msra.gmra.mrb[32].mxu0 %v2965_v59  ;;  %2878 = vmatpush1.bf16.msra.mxu1 %v3712_v62 }
 0x86c   :  { %2306 = vmatprep.mubr.msk.f32.mxu1 %vm86_vm0, %v2967_v38  ;;  %2879 = vmatprep.subr.bf16.mxu1 %v3012_v48  ;;  %v2969_v62 = vpop.eup %2968  ;;  %vm2229_vm0 = vcmask 1043459  }
 0x86f   :  { %2881 = vmatpush1.bf16.msra.mxu1 %v3719_v60 }
 0x870   :  { %2882 = vmatprep.subr.bf16.mxu1 %v3012_v48 }
 0x873   :  { %2884 = vmatpush1.bf16.msra.mxu1 %v3731_v2 }
 0x874   :  { %2885 = vmatprep.subr.bf16.mxu1 %v3012_v48 }
 0x877   :  { %2887 = vmatpush1.bf16.msra.mxu1 %v3743_v6 }
 0x878   :  { %2888 = vmatprep.subr.bf16.mxu1 %v3012_v48 }
 0x87b   :  { %2890 = vmatpush1.bf16.msra.mxu1 %v3755_v11 }
 0x87c   :  { %2891 = vmatprep.subr.bf16.mxu1 %v3012_v48 }
 0x87f   :  { %2893 = vmatpush1.bf16.msra.mxu1 %v3769_v14 }
 0x880   :  { %2894 = vmatprep.subr.bf16.mxu1 %v3012_v48 }
 0x883   :  { %2896 = vmatpush1.bf16.msra.mxu1 %v3781_v17 }
 0x884   :  { %2897 = vmatprep.subr.bf16.mxu1 %v3012_v48 }
 0x887   :  { %2899 = vmatpush1.bf16.msra.mxu1 %v3793_v20 }
 0x888   :  { %2900 = vmatprep.subr.bf16.mxu1 %v3012_v48 }
 0x88b   :  { %2902 = vmatpush1.bf16.msra.mxu1 %v3804_v23 }
 0x88c   :  { %2903 = vmatprep.subr.bf16.mxu1 %v3012_v48 }
 0x88f   :  { %2905 = vmatpush1.bf16.msra.mxu1 %v3815_v26 }
 0x892   :  { %1961 = vmatmul.mubr.f32.vlgmr.msra.gmra.mrb[30].mxu1 %v2969_v62  ;;  %v2106_v62 = vrot.slane %v2098_v53, %v2097_v51 }
 0x93d   :  { %v1788_v60 = vpop.f32.mrb[28].mxu1 }
 0x93e   :  { %v1789_v0 = vadd.f32 %v2303_v63, %v1788_v60  ;;  %v1875_v1 = vpop.f32.mrb[32].mxu0  ;;  %v1790_v2 = vpop.f32.mrb[29].mxu1 }
 0x93f   :  { %v1876_v4 = vadd.f32 %v2303_v63, %v1875_v1  ;;  %v1877_v5 = vpop.f32.mrb[33].mxu0 }
 0x941   :  { %v1966_v6 = vmax.f32 %v1789_v0, %v1876_v4 }
 0x965   :  { %v1962_v7 = vpop.f32.mrb[30].mxu1 }
 0x966   :  { %v1963_v9 = vadd.f32 %v2303_v63, %v1962_v7  ;;  %v1964_v11 = vpop.f32.mrb[31].mxu1  ;;  %v2113_v63 = vrot.slane %v2099_v56, %v2097_v51 }
 0x968   :  { %v1967_v12 = vmax.f32 %v1966_v6, %v1963_v9 }
 0x96a   :  { %v1968_v48 = vsub.f32 %v1789_v0, %v1967_v12  ;;  %v1971_v13 = vsub.f32 %v1876_v4, %v1967_v12  ;;  %v1974_v14 = vsub.f32 %v1963_v9, %v1967_v12 }
 0x96c   :  { %v1969_v15 = vmul.f32 1.442695, %v1968_v48  ;;  %v1972_v16 = vmul.f32 1.442695, %v1971_v13  ;;  %v1975_v17 = vmul.f32 1.442695, %v1974_v14  ;;  %v2114_v13 = vcombine.high %v2106_v62, %v2106_v62 }
 0x96d   :  { %v2115_v14 = vcombine.high %v2113_v63, %v2113_v63 }
 0x96e   :  { %2970 = vpow2.f32 %v1969_v15 }
 0x96f   :  { %2972 = vpow2.f32 %v1972_v16 }
 0x970   :  { %2974 = vpow2.f32 %v1975_v17  ;;  %v2123_v17 = vrot.slane %v2113_v63, %v3835_v21 }
 0x978   :  { %v2971_v19 = vpop.eup %2970 }
 0x979   :  { %v2973_v8 = vpop.eup %2972 }
 0x97a   :  { %v1977_v20 = vadd.f32 %v2973_v8, %v2971_v19  ;;  %v2975_v10 = vpop.eup %2974 }
 0x97c   :  { %v1978_v22 = vadd.f32 %v2975_v10, %v1977_v20 }
 0x97e   :  { %2976 = vrcp.f32 %v1978_v22 }
 0x988   :  { %v2977_v23 = vpop.eup %2976 }
 0x989   :  { %v1980_v24 = vmul.f32 %v2977_v23, %v2971_v19  ;;  %v2014_v25 = vmul.f32 %v2977_v23, %v2973_v8  ;;  %v2053_v26 = vmul.f32 %v2977_v23, %v2975_v10  ;;  %v2119_v19 = vrot.slane %v2106_v62, %v3835_v21 }
 0x98b   :  { %v1991_v27 = vrot.slane %v1980_v24, %v3826_v33  ;;  %v1984_v28 = vrot.slane %v1980_v24, %v3835_v21  ;;  %v2025_v34 = vrot.slane %v2014_v25, %v3826_v33  ;;  %v2018_v35 = vrot.slane %v2014_v25, %v3835_v21 }
 0x98c   :  { %v2032_v29 = vrot.slane %v2014_v25, %v3829_v18  ;;  %v1998_v32 = vrot.slane %v1980_v24, %v3829_v18  ;;  %v2039_v37 = vrot.slane %v2014_v25, %v2004_v36  ;;  %v2005_v39 = vrot.slane %v1980_v24, %v2004_v36 }
 0x98d   :  { %1993 = vbcast.lane.b32.xlu1 %v1991_v27, 256  ;;  %1986 = vbcast.lane.b32.xlu0 %v1984_v28, 256  ;;  %v2064_v40 = vrot.slane %v2053_v26, %v3826_v33  ;;  %v2057_v41 = vrot.slane %v2053_v26, %v3835_v21  ;;  %v2078_v42 = vrot.slane %v2053_v26, %v2004_v36 }
 0x98e   :  { %v2071_v43 = vrot.slane %v2053_v26, %v3829_v18  ;;  %v2307_v18 = vld [vmem:[%s3933_s20 + $0x8] sm:$0x1f]  ;;  %v2127_v27 = vrot.slane %v2114_v13, %v3835_v21  ;;  %v2131_v28 = vrot.slane %v2115_v14, %v3835_v21  ;;  %v2309_v21 = vld [vmem:[#allocation2] ss:$0 sm:$0xff]  ;;  %s3018_s20 = smov [#allocation3]  }
 0x98f   :  { %s2240_s14 = sshll.u32 %s3018_s20, 4  ;;  %s2241_s14 = int_to_ptr.vmem [resolvable:$true] %s2240_s14 }
 0x990   :  { %s2986_s5 = scalar_lea.vmem %s2241_s14, 64  ;;  %p2991_p1 = scmp.lt.s32.totalorder %s2241_s14, %s2241_s14 }
 0x991   :  { %2027 = vbcast.lane.b32.xlu1 %v2025_v34, 256  ;;  %2020 = vbcast.lane.b32.xlu0 %v2018_v35, 256  ;;  %p2987_p0 = scmp.ne.s32.totalorder %s2241_s14, %s2986_s5  ;;  %p2992_p2 = scmp.lt.s32.totalorder %s2986_s5, %s2986_s5 }
 0x993   :  { %p2993_p3 = por %p2992_p2, %p2991_p1 }
 0x995   :  { %2034 = vbcast.lane.b32.xlu1 %v2032_v29, 256  ;;  %2000 = vbcast.lane.b32.xlu0 %v1998_v32, 256  ;;  %p2994_p4 = pnand %p2993_p3, %p2987_p0 }
 0x999   :  { %2041 = vbcast.lane.b32.xlu1 %v2039_v37, 256  ;;  %2007 = vbcast.lane.b32.xlu0 %v2005_v39, 256 }
 0x99d   :  { %2066 = vbcast.lane.b32.xlu1 %v2064_v40, 256  ;;  %2059 = vbcast.lane.b32.xlu0 %v2057_v41, 256 }
 0x9a1   :  { %2080 = vbcast.lane.b32.xlu1 %v2078_v42, 256  ;;  %2073 = vbcast.lane.b32.xlu0 %v2071_v43, 256 }
 0x9ff   :  { %v1994_v49 = vpop.permute.xlu1 %1993  ;;  %v1987_v50 = vpop.permute.xlu0 %1986 }
 0xa00   :  { %v2011_v60 = vmul.f32 %v2009_v57, %v1994_v49  ;;  %v2010_v0 = vmul.f32 %v2009_v57, %v1987_v50 }
 0xa03   :  { %v2028_v33 = vpop.permute.xlu1 %2027  ;;  %v2021_v52 = vpop.permute.xlu0 %2020 }
 0xa04   :  { %v2046_v38 = vmul.f32 %v2307_v18, %v2028_v33  ;;  %v2045_v61 = vmul.f32 %v2307_v18, %v2021_v52 }
 0xa06   :  { %v2050_v9 = vadd.f32 %v2046_v38, %v2011_v60  ;;  %v2049_v11 = vadd.f32 %v2045_v61, %v2010_v0 }
 0xa07   :  { %v2035_v54 = vpop.permute.xlu1 %2034  ;;  %v2001_v55 = vpop.permute.xlu0 %2000 }
 0xa08   :  { %v2047_v1 = vmul.f32 %v2307_v18, %v2035_v54  ;;  %v2012_v2 = vmul.f32 %v2009_v57, %v2001_v55 }
 0xa0a   :  { %v2051_v8 = vadd.f32 %v2047_v1, %v2012_v2 }
 0xa0b   :  { %v2042_v58 = vpop.permute.xlu1 %2041  ;;  %v2008_v59 = vpop.permute.xlu0 %2007 }
 0xa0c   :  { %v2048_v4 = vmul.f32 %v2307_v18, %v2042_v58  ;;  %v2013_v5 = vmul.f32 %v2009_v57, %v2008_v59  ;;  %v2208_v57 = vand.u32 127, %v1688_v30 }
 0xa0e   :  { %v2052_v20 = vadd.f32 %v2048_v4, %v2013_v5  ;;  %v2211_v1 = vsub.s32 %v2208_v57, %v3823_v31 }
 0xa0f   :  { %v2067_v6 = vpop.permute.xlu1 %2066  ;;  %v2060_v7 = vpop.permute.xlu0 %2059 }
 0xa10   :  { %v2085_v12 = vmul.f32 %v2308_v3, %v2067_v6  ;;  %v2084_v48 = vmul.f32 %v2308_v3, %v2060_v7 }
 0xa12   :  { %v2089_v15 = vadd.f32 %v2085_v12, %v2050_v9  ;;  %v2088_v16 = vadd.f32 %v2084_v48, %v2049_v11 }
 0xa13   :  { %v2081_v10 = vpop.permute.xlu1 %2080  ;;  %v2074_v22 = vpop.permute.xlu0 %2073 }
 0xa14   :  { %v2087_v23 = vmul.f32 %v2308_v3, %v2081_v10  ;;  %v2086_v24 = vmul.f32 %v2308_v3, %v2074_v22  ;;  %v2137_v25 = vsub.f32 %v2123_v17, %v2089_v15  ;;  %v2136_v26 = vsub.f32 %v2119_v19, %v2088_v16 }
 0xa16   :  { %v2091_v34 = vadd.f32 %v2087_v23, %v2052_v20  ;;  %v2090_v35 = vadd.f32 %v2086_v24, %v2051_v8  ;;  %v2141_v29 = vmul.f32 %v2137_v25, %v2137_v25  ;;  %v2140_v32 = vmul.f32 %v2136_v26, %v2136_v26 }
 0xa18   :  { %v2148_v36 = vsel %vm2144_vm5, %v2141_v29, 0.0  ;;  %v2145_v37 = vsel %vm2144_vm5, %v2140_v32, 0.0  ;;  %v2138_v39 = vsub.f32 %v2127_v27, %v2090_v35  ;;  %v2139_v40 = vsub.f32 %v2131_v28, %v2091_v34 }
 0xa19   :  { %2149 = vadd.xlane.f32.xlu1 %v2148_v36  ;;  %2146 = vadd.xlane.f32.xlu0 %v2145_v37 }
 0xa1a   :  { %v2142_v41 = vmul.f32 %v2138_v39, %v2138_v39  ;;  %v2143_v43 = vmul.f32 %v2139_v40, %v2139_v40 }
 0xa1c   :  { %v2151_v42 = vsel %vm2144_vm5, %v2142_v41, 0.0  ;;  %v2154_v44 = vsel %vm2144_vm5, %v2143_v43, 0.0 }
 0xa1d   :  { %2152 = vadd.xlane.f32.xlu0 %v2151_v42 }
 0xa21   :  { %2155 = vadd.xlane.f32.xlu0 %v2154_v44 }
 0xa2a   :  { %2196 = vperm.xlu1 %2915, %v2309_v21  }
 0xaa6   :  { %v2150_v45 = vpop.xlane.xlu1 %2149  ;;  %v2147_v46 = vpop.xlane.xlu0 %2146 }
 0xaa7   :  { %2978 = vrsqrt.f32 %v2150_v45  ;;  %vm2166_vm6 = vcmp.eq.f32.partialorder %v2150_v45, inf  ;;  %v2169_v53 = vand.u32 2147483648, %v2150_v45  ;;  %vm2168_vm7 = vcmp.eq.f32.partialorder %v2150_v45, 0.0 }
 0xaa8   :  { %2980 = vrsqrt.f32 %v2147_v46  ;;  %vm2159_vm8 = vcmp.eq.f32.partialorder %v2147_v46, inf  ;;  %v2162_v55 = vand.u32 2147483648, %v2147_v46  ;;  %vm2161_vm9 = vcmp.eq.f32.partialorder %v2147_v46, 0.0 }
 0xaaa   :  { %v2153_v47 = vpop.xlane.xlu0 %2152  ;;  %v2197_v62 = vpop.permute.xlu1 %2196 }
 0xaab   :  { %2982 = vrsqrt.f32 %v2153_v47  ;;  %vm2173_vm10 = vcmp.eq.f32.partialorder %v2153_v47, inf  ;;  %v2176_v63 = vand.u32 2147483648, %v2153_v47  ;;  %vm2175_vm11 = vcmp.eq.f32.partialorder %v2153_v47, 0.0 }
 0xaae   :  { %v2156_v49 = vpop.xlane.xlu0 %2155 }
 0xaaf   :  { %2984 = vrsqrt.f32 %v2156_v49  ;;  %vm2180_vm12 = vcmp.eq.f32.partialorder %v2156_v49, inf  ;;  %v2183_v30 = vand.u32 2147483648, %v2156_v49  ;;  %vm2182_vm13 = vcmp.eq.f32.partialorder %v2156_v49, 0.0 }
 0xab1   :  { %v2979_v50 = vpop.eup %2978 }
 0xab2   :  { %v2981_v51 = vpop.eup %2980  ;;  %v2165_v33 = vmul.f32 %v2979_v50, %v2150_v45 }
 0xab3   :  { %v2158_v52 = vmul.f32 %v2981_v51, %v2147_v46 }
 0xab4   :  { %v2167_v54 = vsel %vm2166_vm6, %v2150_v45, %v2165_v33 }
 0xab5   :  { %v2983_v56 = vpop.eup %2982  ;;  %v2170_v18 = vsel %vm2168_vm7, %v2169_v53, %v2167_v54  ;;  %v2160_v58 = vsel %vm2159_vm8, %v2147_v46, %v2158_v52 }
 0xab6   :  { %v2172_v59 = vmul.f32 %v2983_v56, %v2153_v47  ;;  %v2186_v38 = vsub.f32 0.0, %v2170_v18  ;;  %v2163_v61 = vsel %vm2161_vm9, %v2162_v55, %v2160_v58 }
 0xab7   :  { %v2185_v3 = vsub.f32 0.0, %v2163_v61 }
 0xab8   :  { %v2174_v60 = vsel %vm2173_vm10, %v2153_v47, %v2172_v59  ;;  %v2200_v7 = vmul.f32 %v2197_v62, %v2186_v38 }
 0xab9   :  { %v2985_v0 = vpop.eup %2984  ;;  %v2177_v2 = vsel %vm2175_vm11, %v2176_v63, %v2174_v60  ;;  %v2199_v6 = vmul.f32 %v2197_v62, %v2185_v3 }
 0xaba   :  { %v2179_v4 = vmul.f32 %v2985_v0, %v2156_v49  ;;  %v2187_v5 = vsub.f32 0.0, %v2177_v2  ;;  %v2216_v14 = vrot.slane %v2200_v7, %v2211_v1 }
 0xabb   :  { %v2212_v13 = vrot.slane %v2199_v6, %v2211_v1 }
 0xabc   :  { %v2181_v9 = vsel %vm2180_vm12, %v2156_v49, %v2179_v4  ;;  %v2201_v11 = vmul.f32 %v2197_v62, %v2187_v5 }
 0xabd   :  { %v2184_v12 = vsel %vm2182_vm13, %v2183_v30, %v2181_v9  ;;  %v2226_v17 = vsel %vm2225_vm14, %v2216_v14, %v2212_v13 }
 0xabe   :  { %v2188_v48 = vsub.f32 0.0, %v2184_v12  ;;  %v2220_v15 = vrot.slane %v2201_v11, %v2211_v1 }
 0xac0   :  { %v2202_v16 = vmul.f32 %v2197_v62, %v2188_v48  ;;  %v2228_v19 = vsel %vm2227_vm15, %v2220_v15, %v2226_v17 }
 0xac2   :  { %v2224_v31 = vrot.slane %v2202_v16, %v2211_v1 }
 0xac4   :  { %v2230_v8 = vsel %vm2229_vm0, %v2224_v31, %v2228_v19 }
 0xac5   :  { %2233 = vst.msk [vmem:[#allocation3] sm:$0xf] %vm2232_vm1, %v2230_v8 }
 0xac6   :  { %2997 = shalt.err (!%p2994_p4)
}
 0xac7   :  { %s2998_s9 = scalar_lea.hbm %s3935_s22, 64 }
 0xac8   :  { %p2999_p5 = scmp.ne.s32.totalorder %s3935_s22, %s2998_s9  ;;  %p3002_p6 = scmp.lt.u32.totalorder %s2998_s9, %s3935_s22 }
 0xaca   :  { %p3004_p7 = pnand %p3002_p6, %p2999_p5 }
 0xacc   :  { %3007 = shalt.err (!%p3004_p7)
}
 0xacd   :  { %2243 = dma.vmem_to_hbm [thread:$0]  %s2241_s14, 64, %s3935_s22, [#allocation4]  }
 0xace   :  { %3008 = dma.done.wait [#allocation4], 64  }
 0xacf   :  { %3009 = vsyncadd [#allocation4], 4294967232 }
 0xad0   :  { %2247 = vsyncpa [#allocation4], 1 }

</bundles_post_ra>
